<compile_context>
chip_gen: v7x
topology: tpu7x:2x2x1
jax: 0.10.0
libtpu: 0.0.40
codegen_flags: <defaults>
</compile_context>

<pallas_src>
import functools

import jax
import jax.numpy as jnp
from jax import lax
from jax.experimental import pallas as pl
from jax.experimental.pallas import tpu as pltpu


_NEG_BIG = -1e30  # finite "-inf": padded lanes give exp(-huge)=0, never NaN


# ---------------------------------------------------------------------------
# Kernel 1: fused all-heads QKV projection (Q pre-scaled, K emitted transposed)
# Grid: (batch, row_tile).
# ---------------------------------------------------------------------------
def _qkv_proj_kernel(x_ref, w_ref, q_ref, k_ref, v_ref, *, heads, dim_head):
    inner = heads * dim_head
    x = x_ref[...]                                                 # [tn, d] bf16
    y = jnp.dot(x, w_ref[...], preferred_element_type=jnp.float32)  # [tn, 3*inner]
    kt = jnp.transpose(y[:, inner:2 * inner])                      # [inner, tn]
    for h in range(heads):
        lo = h * dim_head
        hi = lo + dim_head
        q_ref[h] = y[:, lo:hi].astype(q_ref.dtype)                          # [tn, dh]
        k_ref[h] = kt[lo:hi, :].astype(k_ref.dtype)                         # [dh, tn]
        v_ref[h] = y[:, 2 * inner + lo:2 * inner + hi].astype(v_ref.dtype)  # [tn, dh]


# ---------------------------------------------------------------------------
# Kernel 2: flash attention (online softmax over kv tiles) fused with a single
# full-depth output projection per (batch, q_tile).
# Grid: (batch, q_tile, head, kv_tile).
# ---------------------------------------------------------------------------
def _flash_attn_kernel(q_ref, k_ref, v_ref, wout_ref, bias_ref, o_ref,
                       m_sc, l_sc, acc_sc, hv_sc, *,
                       heads, dim_head, kv_tile, seq_len, needs_mask):
    hi = pl.program_id(2)
    ki = pl.program_id(3)
    nh = pl.num_programs(2)
    nk = pl.num_programs(3)

    # Per-head online-softmax state reset at the first kv tile.
    @pl.when(ki == 0)
    def _():
        m_sc[...] = jnp.full(m_sc.shape, _NEG_BIG, dtype=m_sc.dtype)
        l_sc[...] = jnp.zeros(l_sc.shape, dtype=l_sc.dtype)
        acc_sc[...] = jnp.zeros(acc_sc.shape, dtype=acc_sc.dtype)

    q = q_ref[...]                                   # [tq, dh] bf16 (pre-scaled)
    k = k_ref[...]                                   # [dh, tk] bf16 (pre-transposed)
    v = v_ref[...]                                   # [tk, dh] bf16

    # Scores: plain MXU matmul, K already [dh, tk] so no in-kernel relayout.
    s = jnp.dot(q, k, preferred_element_type=jnp.float32)   # [tq, tk] f32

    if needs_mask:
        kv_pos = ki * kv_tile + lax.broadcasted_iota(jnp.int32, s.shape, 1)
        s = jnp.where(kv_pos < seq_len, s, _NEG_BIG)

    m_prev = m_sc[...]                                       # [tq, 1]
    m_new = jnp.maximum(m_prev, jnp.max(s, axis=-1, keepdims=True))
    alpha = jnp.exp(m_prev - m_new)                          # rescale factor
    p = jnp.exp(s - m_new)                                   # [tq, tk] f32

    l_sc[...] = alpha * l_sc[...] + jnp.sum(p, axis=-1, keepdims=True)
    acc_sc[...] = alpha * acc_sc[...] + jnp.dot(
        p.astype(v.dtype), v, preferred_element_type=jnp.float32)   # [tq, dh]
    m_sc[...] = m_new

    # Last kv tile for this head: normalize and stash this head's output into
    # its column slice of the [tq, inner] bf16 scratch (static slices per head).
    @pl.when(ki == nk - 1)
    def _():
        inv_l = pl.reciprocal(l_sc[...], approx=False)       # exact; once per head
        head_out = (acc_sc[...] * inv_l).astype(hv_sc.dtype)  # [tq, dh] bf16
        for h in range(heads):
            @pl.when(hi == h)
            def _(h=h):
                hv_sc[:, h * dim_head:(h + 1) * dim_head] = head_out

    # Last head & last kv tile: one full-depth [tq, inner] @ [inner, d] matmul
    # + bias, emitted as a lane-dense output tile.
    @pl.when((hi == nh - 1) & (ki == nk - 1))
    def _():
        o_ref[...] = (jnp.dot(hv_sc[...], wout_ref[...],
                              preferred_element_type=jnp.float32)
                      + bias_ref[...]).astype(o_ref.dtype)


# ---------------------------------------------------------------------------
# Wrapper
# ---------------------------------------------------------------------------
def prepare_fast_attention_params(w_qkv, w_out, b_out, *, heads, dim_head,
                                  compute_dtype=jnp.bfloat16):
    """One-time weight prep (call once / let jit constant-fold it).
    w_qkv: [d, 3*inner], w_out: [inner, d], b_out: [d]  ([in, out] layout)."""
    d = w_qkv.shape[0]
    inner = heads * dim_head
    assert w_qkv.shape == (d, 3 * inner)
    assert w_out.shape == (inner, d)
    assert b_out.shape == (d,)
    scale = dim_head ** (-0.5)
    # Fold the softmax scale into the Q projection columns (zero in-kernel cost).
    w_fused = jnp.concatenate(
        [w_qkv[:, :inner] * scale, w_qkv[:, inner:]], axis=1).astype(compute_dtype)
    w_o = w_out.astype(compute_dtype)
    bias2d = b_out.reshape(1, d).astype(jnp.float32)
    return w_fused, w_o, bias2d


def fast_attention_prepared(x, w_fused, w_o, bias2d, *, heads, dim_head):
    b, n, d = x.shape
    inner = heads * dim_head
    compute_dtype = w_fused.dtype

    # Pad the sequence to a multiple of 128 so every tile is (8,128)-aligned;
    # padded KV positions are masked in-kernel, output rows trimmed after.
    n_pad = ((n + 127) // 128) * 128
    needs_mask = n_pad != n
    x_c = x.astype(compute_dtype)
    if needs_mask:
        x_c = jnp.pad(x_c, ((0, 0), (0, n_pad - n), (0, 0)))

    tn = 128            # kernel-1 row tile
    tq = 128            # query tile (bounds [tq, tk] score tile / vregs)
    if n_pad % 512 == 0:
        tk = 512        # large KV tiles: fewer grid steps, bigger DMAs
    elif n_pad % 256 == 0:
        tk = 256
    else:
        tk = 128

    vmem_limit = 48 * 1024 * 1024   # safe on v5e/v6e (128 MiB) and v7x (64 MiB)

    # ---- Kernel 1: fused QKV projection --------------------------------
    qv_struct = jax.ShapeDtypeStruct((b, heads, n_pad, dim_head), compute_dtype)
    kt_struct = jax.ShapeDtypeStruct((b, heads, dim_head, n_pad), compute_dtype)

    qv_spec = pl.BlockSpec((pl.Squeezed(), heads, tn, dim_head),
                           lambda bi, ni: (bi, 0, ni, 0))
    kt_spec = pl.BlockSpec((pl.Squeezed(), heads, dim_head, tn),
                           lambda bi, ni: (bi, 0, 0, ni))

    q, k, v = pl.pallas_call(
        functools.partial(_qkv_proj_kernel, heads=heads, dim_head=dim_head),
        out_shape=(qv_struct, kt_struct, qv_struct),
        grid_spec=pltpu.PrefetchScalarGridSpec(
            num_scalar_prefetch=0,
            grid=(b, n_pad // tn),
            in_specs=[
                pl.BlockSpec((pl.Squeezed(), tn, d),
                             lambda bi, ni: (bi, ni, 0)),          # x row tile
                pl.BlockSpec((d, 3 * inner),
                             lambda bi, ni: (0, 0)),               # fused W (resident)
            ],
            out_specs=(qv_spec, kt_spec, qv_spec),
        ),
        compiler_params=pltpu.CompilerParams(
            dimension_semantics=("parallel", "parallel"),
            vmem_limit_bytes=vmem_limit),
    )(x_c, w_fused)

    # ---- Kernel 2: flash attention + fused full-depth output projection ----
    out = pl.pallas_call(
        functools.partial(_flash_attn_kernel, heads=heads, dim_head=dim_head,
                          kv_tile=tk, seq_len=n, needs_mask=needs_mask),
        out_shape=jax.ShapeDtypeStruct((b, n_pad, d), x.dtype),
        grid_spec=pltpu.PrefetchScalarGridSpec(
            num_scalar_prefetch=0,
            grid=(b, n_pad // tq, heads, n_pad // tk),
            in_specs=[
                pl.BlockSpec((pl.Squeezed(), pl.Squeezed(), tq, dim_head),
                             lambda bi, qi, hi, ki: (bi, hi, qi, 0)),   # Q
                pl.BlockSpec((pl.Squeezed(), pl.Squeezed(), dim_head, tk),
                             lambda bi, qi, hi, ki: (bi, hi, 0, ki)),   # K^T
                pl.BlockSpec((pl.Squeezed(), pl.Squeezed(), tk, dim_head),
                             lambda bi, qi, hi, ki: (bi, hi, ki, 0)),   # V
                pl.BlockSpec((inner, d),
                             lambda bi, qi, hi, ki: (0, 0)),            # W_out (resident)
                pl.BlockSpec((1, d),
                             lambda bi, qi, hi, ki: (0, 0)),            # bias (resident)
            ],
            out_specs=pl.BlockSpec((pl.Squeezed(), tq, d),
                                   lambda bi, qi, hi, ki: (bi, qi, 0)),
            scratch_shapes=[
                pltpu.VMEM((tq, 1), jnp.float32),          # running max m
                pltpu.VMEM((tq, 1), jnp.float32),          # running denom l
                pltpu.VMEM((tq, dim_head), jnp.float32),   # per-head PV acc
                pltpu.VMEM((tq, inner), compute_dtype),    # concat head outputs
            ],
        ),
        compiler_params=pltpu.CompilerParams(
            dimension_semantics=("parallel", "parallel", "arbitrary", "arbitrary"),
            vmem_limit_bytes=vmem_limit),
    )(q, k, v, w_o, bias2d)

    if needs_mask:
        out = out[:, :n, :]
    return out


def fast_attention(x, w_qkv, w_out, b_out, *, heads: int, dim_head: int):
    params = prepare_fast_attention_params(w_qkv, w_out, b_out,
                                           heads=heads, dim_head=dim_head)
    return fast_attention_prepared(x, *params, heads=heads, dim_head=dim_head)


# ---------------------------------------------------------------------------
# Pure-JAX f32 reference matching the PyTorch forward semantics.
# ---------------------------------------------------------------------------
def fast_attention_ref(x, w_qkv, w_out, b_out, *, heads: int, dim_head: int):
    b, n, d = x.shape
    inner = heads * dim_head
    scale = dim_head ** (-0.5)

    qkv = x @ w_qkv                                       # [b, n, 3*inner]
    q, k, v = jnp.split(qkv, 3, axis=-1)

    def to_heads(t):
        return t.reshape(b, n, heads, dim_head).transpose(0, 2, 1, 3)

    q, k, v = map(to_heads, (q, k, v))                    # [b, h, n, dh]
    dots = jnp.einsum("bhqd,bhkd->bhqk", q, k) * scale
    attn = jax.nn.softmax(dots, axis=-1)
    out = jnp.einsum("bhqk,bhkd->bhqd", attn, v)
    out = out.transpose(0, 2, 1, 3).reshape(b, n, inner)
    return out @ w_out + b_out


if __name__ == "__main__":
    # Shapes consistent with the module defaults: dim=64, heads=4, dim_head=64.
    B, N, DIM = 2, 8, 64
    HEADS, DIM_HEAD = 4, 64
    INNER = HEADS * DIM_HEAD

    key = jax.random.PRNGKey(0)
    kx, kqkv, kout, kb = jax.random.split(key, 4)

    x = jax.random.normal(kx, (B, N, DIM), dtype=jnp.float32)
    w_qkv = jax.random.normal(kqkv, (DIM, 3 * INNER), dtype=jnp.float32) * (DIM ** -0.5)
    w_out = jax.random.normal(kout, (INNER, DIM), dtype=jnp.float32) * (INNER ** -0.5)
    b_out = jax.random.normal(kb, (DIM,), dtype=jnp.float32) * 0.01

    y = fast_attention(x, w_qkv, w_out, b_out, heads=HEADS, dim_head=DIM_HEAD)
    y = jax.block_until_ready(y)

    y_ref = fast_attention_ref(x, w_qkv, w_out, b_out, heads=HEADS, dim_head=DIM_HEAD)
    assert y.shape == (B, N, DIM)
    # bf16 MXU operands (f32 accumulation) => loosened tolerance vs the f32 reference.
    assert jnp.allclose(y, y_ref, rtol=5e-2, atol=5e-2), "mismatch vs reference"

    print("KERNEL_OK")
</pallas_src>

<mosaic_0001>
module attributes {stable_mosaic.version = 11 : i64} {
  func.func @_qkv_proj_kernel(%arg0: i32, %arg1: i32, %arg2: memref<1x128x64xbf16, #tpu.memory_space<vmem>>, %arg3: memref<64x768xbf16, #tpu.memory_space<vmem>>, %arg4: memref<1x4x128x64xbf16, #tpu.memory_space<vmem>>, %arg5: memref<1x4x64x128xbf16, #tpu.memory_space<vmem>>, %arg6: memref<1x4x128x64xbf16, #tpu.memory_space<vmem>>) attributes {dimension_semantics = [#tpu.dimension_semantics<parallel>, #tpu.dimension_semantics<parallel>], iteration_bounds = array<i64: 2, 1>, scalar_prefetch = 0 : i64, scratch_operands = 0 : i64, tpu.core_type = #tpu.core_type<tc>, window_params = [{transform_indices = @transform_0, window_bounds = array<i64: 1, 128, 64>}, {pipeline_mode = #tpu.pipeline_mode<synchronous>, transform_indices = @transform_1, window_bounds = array<i64: 64, 768>}, {transform_indices = @transform_2, window_bounds = array<i64: 1, 4, 128, 64>}, {transform_indices = @transform_3, window_bounds = array<i64: 1, 4, 64, 128>}, {transform_indices = @transform_4, window_bounds = array<i64: 1, 4, 128, 64>}]} {
    %c0 = arith.constant 0 : index
    %c0_0 = arith.constant 0 : index
    %c0_1 = arith.constant 0 : index
    %0 = vector.load %arg2[%c0, %c0_0, %c0_1] : memref<1x128x64xbf16, #tpu.memory_space<vmem>>, vector<1x128x64xbf16>
    %1 = vector.shape_cast %0 : vector<1x128x64xbf16> to vector<128x64xbf16>
    %c0_2 = arith.constant 0 : index
    %c0_3 = arith.constant 0 : index
    %2 = vector.load %arg3[%c0_2, %c0_3] : memref<64x768xbf16, #tpu.memory_space<vmem>>, vector<64x768xbf16>
    %cst = arith.constant dense<0.000000e+00> : vector<128x768xf32>
    %3 = tpu.matmul %1, %2, %cst {dimension_numbers = #tpu.dot_dimension_numbers<[1], [0], [0], [1], [0, 0, 1, 1], [], []>} : vector<128x64xbf16>, vector<64x768xbf16>, vector<128x768xf32> -> vector<128x768xf32>
    %4 = vector.extract_strided_slice %3 {offsets = [0, 256], sizes = [128, 256], strides = [1, 1]} : vector<128x768xf32> to vector<128x256xf32>
    %5 = tpu.transpose %4, [1, 0] : vector<128x256xf32> -> vector<256x128xf32>
    %6 = vector.extract_strided_slice %3 {offsets = [0, 0], sizes = [128, 64], strides = [1, 1]} : vector<128x768xf32> to vector<128x64xf32>
    %7 = arith.truncf %6 : vector<128x64xf32> to vector<128x64xbf16>
    %c0_4 = arith.constant 0 : index
    %c0_5 = arith.constant 0 : index
    %c0_6 = arith.constant 0 : index
    %c0_7 = arith.constant 0 : index
    %8 = vector.load %arg4[%c0_4, %c0_5, %c0_6, %c0_7] : memref<1x4x128x64xbf16, #tpu.memory_space<vmem>>, vector<1x1x128x64xbf16>
    %9 = vector.shape_cast %8 : vector<1x1x128x64xbf16> to vector<128x64xbf16>
    %10 = vector.shape_cast %7 : vector<128x64xbf16> to vector<1x1x128x64xbf16>
    tpu.vector_store %arg4[%c0_4, %c0_5, %c0_6, %c0_7], %10 {strides = array<i32>} : memref<1x4x128x64xbf16, #tpu.memory_space<vmem>>, vector<1x1x128x64xbf16>,
    %11 = vector.extract_strided_slice %5 {offsets = [0, 0], sizes = [64, 128], strides = [1, 1]} : vector<256x128xf32> to vector<64x128xf32>
    %12 = arith.truncf %11 : vector<64x128xf32> to vector<64x128xbf16>
    %c0_8 = arith.constant 0 : index
    %c0_9 = arith.constant 0 : index
    %c0_10 = arith.constant 0 : index
    %c0_11 = arith.constant 0 : index
    %13 = vector.load %arg5[%c0_8, %c0_9, %c0_10, %c0_11] : memref<1x4x64x128xbf16, #tpu.memory_space<vmem>>, vector<1x1x64x128xbf16>
    %14 = vector.shape_cast %13 : vector<1x1x64x128xbf16> to vector<64x128xbf16>
    %15 = vector.shape_cast %12 : vector<64x128xbf16> to vector<1x1x64x128xbf16>
    tpu.vector_store %arg5[%c0_8, %c0_9, %c0_10, %c0_11], %15 {strides = array<i32>} : memref<1x4x64x128xbf16, #tpu.memory_space<vmem>>, vector<1x1x64x128xbf16>,
    %16 = vector.extract_strided_slice %3 {offsets = [0, 512], sizes = [128, 64], strides = [1, 1]} : vector<128x768xf32> to vector<128x64xf32>
    %17 = arith.truncf %16 : vector<128x64xf32> to vector<128x64xbf16>
    %c0_12 = arith.constant 0 : index
    %c0_13 = arith.constant 0 : index
    %c0_14 = arith.constant 0 : index
    %c0_15 = arith.constant 0 : index
    %18 = vector.load %arg6[%c0_12, %c0_13, %c0_14, %c0_15] : memref<1x4x128x64xbf16, #tpu.memory_space<vmem>>, vector<1x1x128x64xbf16>
    %19 = vector.shape_cast %18 : vector<1x1x128x64xbf16> to vector<128x64xbf16>
    %20 = vector.shape_cast %17 : vector<128x64xbf16> to vector<1x1x128x64xbf16>
    tpu.vector_store %arg6[%c0_12, %c0_13, %c0_14, %c0_15], %20 {strides = array<i32>} : memref<1x4x128x64xbf16, #tpu.memory_space<vmem>>, vector<1x1x128x64xbf16>,
    %21 = vector.extract_strided_slice %3 {offsets = [0, 64], sizes = [128, 64], strides = [1, 1]} : vector<128x768xf32> to vector<128x64xf32>
    %22 = arith.truncf %21 : vector<128x64xf32> to vector<128x64xbf16>
    %c0_16 = arith.constant 0 : index
    %c1 = arith.constant 1 : index
    %c0_17 = arith.constant 0 : index
    %c0_18 = arith.constant 0 : index
    %23 = vector.load %arg4[%c0_16, %c1, %c0_17, %c0_18] : memref<1x4x128x64xbf16, #tpu.memory_space<vmem>>, vector<1x1x128x64xbf16>
    %24 = vector.shape_cast %23 : vector<1x1x128x64xbf16> to vector<128x64xbf16>
    %25 = vector.shape_cast %22 : vector<128x64xbf16> to vector<1x1x128x64xbf16>
    tpu.vector_store %arg4[%c0_16, %c1, %c0_17, %c0_18], %25 {strides = array<i32>} : memref<1x4x128x64xbf16, #tpu.memory_space<vmem>>, vector<1x1x128x64xbf16>,
    %26 = vector.extract_strided_slice %5 {offsets = [64, 0], sizes = [64, 128], strides = [1, 1]} : vector<256x128xf32> to vector<64x128xf32>
    %27 = arith.truncf %26 : vector<64x128xf32> to vector<64x128xbf16>
    %c0_19 = arith.constant 0 : index
    %c1_20 = arith.constant 1 : index
    %c0_21 = arith.constant 0 : index
    %c0_22 = arith.constant 0 : index
    %28 = vector.load %arg5[%c0_19, %c1_20, %c0_21, %c0_22] : memref<1x4x64x128xbf16, #tpu.memory_space<vmem>>, vector<1x1x64x128xbf16>
    %29 = vector.shape_cast %28 : vector<1x1x64x128xbf16> to vector<64x128xbf16>
    %30 = vector.shape_cast %27 : vector<64x128xbf16> to vector<1x1x64x128xbf16>
    tpu.vector_store %arg5[%c0_19, %c1_20, %c0_21, %c0_22], %30 {strides = array<i32>} : memref<1x4x64x128xbf16, #tpu.memory_space<vmem>>, vector<1x1x64x128xbf16>,
    %31 = vector.extract_strided_slice %3 {offsets = [0, 576], sizes = [128, 64], strides = [1, 1]} : vector<128x768xf32> to vector<128x64xf32>
    %32 = arith.truncf %31 : vector<128x64xf32> to vector<128x64xbf16>
    %c0_23 = arith.constant 0 : index
    %c1_24 = arith.constant 1 : index
    %c0_25 = arith.constant 0 : index
    %c0_26 = arith.constant 0 : index
    %33 = vector.load %arg6[%c0_23, %c1_24, %c0_25, %c0_26] : memref<1x4x128x64xbf16, #tpu.memory_space<vmem>>, vector<1x1x128x64xbf16>
    %34 = vector.shape_cast %33 : vector<1x1x128x64xbf16> to vector<128x64xbf16>
    %35 = vector.shape_cast %32 : vector<128x64xbf16> to vector<1x1x128x64xbf16>
    tpu.vector_store %arg6[%c0_23, %c1_24, %c0_25, %c0_26], %35 {strides = array<i32>} : memref<1x4x128x64xbf16, #tpu.memory_space<vmem>>, vector<1x1x128x64xbf16>,
    %36 = vector.extract_strided_slice %3 {offsets = [0, 128], sizes = [128, 64], strides = [1, 1]} : vector<128x768xf32> to vector<128x64xf32>
    %37 = arith.truncf %36 : vector<128x64xf32> to vector<128x64xbf16>
    %c0_27 = arith.constant 0 : index
    %c2 = arith.constant 2 : index
    %c0_28 = arith.constant 0 : index
    %c0_29 = arith.constant 0 : index
    %38 = vector.load %arg4[%c0_27, %c2, %c0_28, %c0_29] : memref<1x4x128x64xbf16, #tpu.memory_space<vmem>>, vector<1x1x128x64xbf16>
    %39 = vector.shape_cast %38 : vector<1x1x128x64xbf16> to vector<128x64xbf16>
    %40 = vector.shape_cast %37 : vector<128x64xbf16> to vector<1x1x128x64xbf16>
    tpu.vector_store %arg4[%c0_27, %c2, %c0_28, %c0_29], %40 {strides = array<i32>} : memref<1x4x128x64xbf16, #tpu.memory_space<vmem>>, vector<1x1x128x64xbf16>,
    %41 = vector.extract_strided_slice %5 {offsets = [128, 0], sizes = [64, 128], strides = [1, 1]} : vector<256x128xf32> to vector<64x128xf32>
    %42 = arith.truncf %41 : vector<64x128xf32> to vector<64x128xbf16>
    %c0_30 = arith.constant 0 : index
    %c2_31 = arith.constant 2 : index
    %c0_32 = arith.constant 0 : index
    %c0_33 = arith.constant 0 : index
    %43 = vector.load %arg5[%c0_30, %c2_31, %c0_32, %c0_33] : memref<1x4x64x128xbf16, #tpu.memory_space<vmem>>, vector<1x1x64x128xbf16>
    %44 = vector.shape_cast %43 : vector<1x1x64x128xbf16> to vector<64x128xbf16>
    %45 = vector.shape_cast %42 : vector<64x128xbf16> to vector<1x1x64x128xbf16>
    tpu.vector_store %arg5[%c0_30, %c2_31, %c0_32, %c0_33], %45 {strides = array<i32>} : memref<1x4x64x128xbf16, #tpu.memory_space<vmem>>, vector<1x1x64x128xbf16>,
    %46 = vector.extract_strided_slice %3 {offsets = [0, 640], sizes = [128, 64], strides = [1, 1]} : vector<128x768xf32> to vector<128x64xf32>
    %47 = arith.truncf %46 : vector<128x64xf32> to vector<128x64xbf16>
    %c0_34 = arith.constant 0 : index
    %c2_35 = arith.constant 2 : index
    %c0_36 = arith.constant 0 : index
    %c0_37 = arith.constant 0 : index
    %48 = vector.load %arg6[%c0_34, %c2_35, %c0_36, %c0_37] : memref<1x4x128x64xbf16, #tpu.memory_space<vmem>>, vector<1x1x128x64xbf16>
    %49 = vector.shape_cast %48 : vector<1x1x128x64xbf16> to vector<128x64xbf16>
    %50 = vector.shape_cast %47 : vector<128x64xbf16> to vector<1x1x128x64xbf16>
    tpu.vector_store %arg6[%c0_34, %c2_35, %c0_36, %c0_37], %50 {strides = array<i32>} : memref<1x4x128x64xbf16, #tpu.memory_space<vmem>>, vector<1x1x128x64xbf16>,
    %51 = vector.extract_strided_slice %3 {offsets = [0, 192], sizes = [128, 64], strides = [1, 1]} : vector<128x768xf32> to vector<128x64xf32>
    %52 = arith.truncf %51 : vector<128x64xf32> to vector<128x64xbf16>
    %c0_38 = arith.constant 0 : index
    %c3 = arith.constant 3 : index
    %c0_39 = arith.constant 0 : index
    %c0_40 = arith.constant 0 : index
    %53 = vector.load %arg4[%c0_38, %c3, %c0_39, %c0_40] : memref<1x4x128x64xbf16, #tpu.memory_space<vmem>>, vector<1x1x128x64xbf16>
    %54 = vector.shape_cast %53 : vector<1x1x128x64xbf16> to vector<128x64xbf16>
    %55 = vector.shape_cast %52 : vector<128x64xbf16> to vector<1x1x128x64xbf16>
    tpu.vector_store %arg4[%c0_38, %c3, %c0_39, %c0_40], %55 {strides = array<i32>} : memref<1x4x128x64xbf16, #tpu.memory_space<vmem>>, vector<1x1x128x64xbf16>,
    %56 = vector.extract_strided_slice %5 {offsets = [192, 0], sizes = [64, 128], strides = [1, 1]} : vector<256x128xf32> to vector<64x128xf32>
    %57 = arith.truncf %56 : vector<64x128xf32> to vector<64x128xbf16>
    %c0_41 = arith.constant 0 : index
    %c3_42 = arith.constant 3 : index
    %c0_43 = arith.constant 0 : index
    %c0_44 = arith.constant 0 : index
    %58 = vector.load %arg5[%c0_41, %c3_42, %c0_43, %c0_44] : memref<1x4x64x128xbf16, #tpu.memory_space<vmem>>, vector<1x1x64x128xbf16>
    %59 = vector.shape_cast %58 : vector<1x1x64x128xbf16> to vector<64x128xbf16>
    %60 = vector.shape_cast %57 : vector<64x128xbf16> to vector<1x1x64x128xbf16>
    tpu.vector_store %arg5[%c0_41, %c3_42, %c0_43, %c0_44], %60 {strides = array<i32>} : memref<1x4x64x128xbf16, #tpu.memory_space<vmem>>, vector<1x1x64x128xbf16>,
    %61 = vector.extract_strided_slice %3 {offsets = [0, 704], sizes = [128, 64], strides = [1, 1]} : vector<128x768xf32> to vector<128x64xf32>
    %62 = arith.truncf %61 : vector<128x64xf32> to vector<128x64xbf16>
    %c0_45 = arith.constant 0 : index
    %c3_46 = arith.constant 3 : index
    %c0_47 = arith.constant 0 : index
    %c0_48 = arith.constant 0 : index
    %63 = vector.load %arg6[%c0_45, %c3_46, %c0_47, %c0_48] : memref<1x4x128x64xbf16, #tpu.memory_space<vmem>>, vector<1x1x128x64xbf16>
    %64 = vector.shape_cast %63 : vector<1x1x128x64xbf16> to vector<128x64xbf16>
    %65 = vector.shape_cast %62 : vector<128x64xbf16> to vector<1x1x128x64xbf16>
    tpu.vector_store %arg6[%c0_45, %c3_46, %c0_47, %c0_48], %65 {strides = array<i32>} : memref<1x4x128x64xbf16, #tpu.memory_space<vmem>>, vector<1x1x128x64xbf16>,
    return
  }
  func.func @transform_0(%arg0: i32, %arg1: i32) -> (i32, i32, i32) {
    %c0_i32 = arith.constant 0 : i32
    %c0_i32_0 = arith.constant 0 : i32
    return %arg0, %arg1, %c0_i32 : i32, i32, i32
  }
  func.func @transform_1(%arg0: i32, %arg1: i32) -> (i32, i32) {
    %c0_i32 = arith.constant 0 : i32
    %c0_i32_0 = arith.constant 0 : i32
    %c0_i32_1 = arith.constant 0 : i32
    return %c0_i32, %c0_i32_0 : i32, i32
  }
  func.func @transform_2(%arg0: i32, %arg1: i32) -> (i32, i32, i32, i32) {
    %c0_i32 = arith.constant 0 : i32
    %c0_i32_0 = arith.constant 0 : i32
    %c0_i32_1 = arith.constant 0 : i32
    return %arg0, %c0_i32, %arg1, %c0_i32_0 : i32, i32, i32, i32
  }
  func.func @transform_3(%arg0: i32, %arg1: i32) -> (i32, i32, i32, i32) {
    %c0_i32 = arith.constant 0 : i32
    %c0_i32_0 = arith.constant 0 : i32
    %c0_i32_1 = arith.constant 0 : i32
    return %arg0, %c0_i32, %c0_i32_0, %arg1 : i32, i32, i32, i32
  }
  func.func @transform_4(%arg0: i32, %arg1: i32) -> (i32, i32, i32, i32) {
    %c0_i32 = arith.constant 0 : i32
    %c0_i32_0 = arith.constant 0 : i32
    %c0_i32_1 = arith.constant 0 : i32
    return %arg0, %c0_i32, %arg1, %c0_i32_0 : i32, i32, i32, i32
  }
}

</mosaic_0001>

<bundles_post_ra>
// kernel: tpu_custom_call.1
= control target key start
LH: loop header
LB: loop body
LE: loop exit
PB: predicated region body
PF: predicated region fallthrough
CT: control target
= control target key end

     0   :  { %10 = vsyncpa [#allocation3], 0  ;;  %s3573_s0 = inlined_call_operand.vmem [shape: bf16[2,128,64], index: 0, kind: input, shape index: {}]   ;;  %s3574_s1 = inlined_call_operand.vmem [shape: bf16[64,768], index: 1, kind: input, shape index: {}]   ;;  %s3575_s2 = inlined_call_operand.vmem [shape: bf16[2,4,128,64], index: 2, kind: output, shape index: {0}]   ;;  %s3576_s3 = inlined_call_operand.hbm [shape: bf16[2,4,64,128], index: 3, kind: output, shape index: {1}]   ;;  %s3577_s4 = inlined_call_operand.vmem [shape: bf16[2,4,128,64], index: 4, kind: output, shape index: {2}]  }
   0x1   :  { %12 = vsyncpa [#allocation3 + $0x1], 0  ;;  %s2656_s15 = smov 0   ;;  %s2658_s16 = smov 0  }
   0x2   :  { %s2660_s17 = smov 0   ;;  %s2662_s18 = smov 0  }
   0x3   :  { %s2664_s19 = smov 0   ;;  %s2666_s20 = smov 0  }
   0x4 LB: > { %s1841_s21 = sadd.s32 4294967295, %s2625_s20   ;;  %s1842_s22 = sadd.s32 4294967294, %s2625_s20   ;;  %s2625_s20 = sphi %s2666_s20, %s18_s20   ;;  %s2621_s19 = sphi %s2664_s19, %s3595_s19   ;;  %s2617_s18 = sphi %s2662_s18, %s3594_s18   ;;  %s2613_s17 = sphi %s2660_s17, %s3593_s17   ;;  %s2609_s16 = sphi %s2658_s16, %s3592_s16   ;;  %s2605_s15 = sphi %s2656_s15, %s3591_s15  }
   0x5   : > { %s30_s23 = sadd.s32 1, %s2621_s19  ;;  %s116_s24 = sadd.s32 1, %s2613_s17 }
   0x6   : > { %p32_p0 = scmp.ge.s32.totalorder %s30_s23, 2  ;;  %p126_p1 = scmp.ne.s32.totalorder %s2613_s17, %s2609_s16 }
   0x7   : > { %p127_p2 = scmp.eq.s32.totalorder %s1841_s21, 1  ;;  %p132_p3 = scmp.ne.s32.totalorder %s2609_s16, %s2605_s15 }
   0x8   : > { %s3597_s23 = smov (%p32_p0, %s30_s23), 0  ;;  %p133_p5 = scmp.eq.s32.totalorder %s1842_s22, 1 }
   0x9   : > { %p2696_p4 = por %p127_p2, %p126_p1  ;;  %s111_s26 = ssub.s32 %s2621_s19, %s3597_s23 }
   0xa   : > { %p1845_p6 = scmp.ge.s32.totalorder %s2625_s20, 1  ;;  %p114_p7 = scmp.eq.s32.totalorder %s111_s26, 0 }
   0xb   : > { %p2703_p8 = por %p133_p5, %p132_p3  ;;  %p195_p9 = scmp.lt.s32.totalorder %s2625_s20, 3 }
   0xc   : > { %s2709_s28 = scalar_select %p114_p7, %s2613_s17, %s116_s24  }
   0xd   : > { %p196_p10 = pnand %p1845_p6, %p195_p9 }
   0xe   : > { %v2503_v0 = vld [vmem:[%s3574_s1 + $0x4] ss:$24 sps:$4 sm:$0xff] (!%p196_p10)   ;;  %p244_p11 = scmp.lt.s32.totalorder (!%p196_p10), %s2617_s18, 1  ;;  %v2505_v1 = vld [vmem:[%s3574_s1] ss:$24 sps:$4 sm:$0xff] (!%p196_p10)   ;;  %v2627_v2 = vmov (!%p196_p10), 0  }
   0xf   : > { %199 = sbr.rel (%p196_p10) target bundleno = 581 (0x245), region = 28  ;;  %531 = vmatprep.mubr.bf16.mxu0 (!%p196_p10), %v2627_v2  ;;  %571 = vmatprep.mubr.bf16.mxu1 (!%p196_p10), %v2627_v2  ;;  %v2506_v3 = vld [vmem:[%s3574_s1 + $0x34] ss:$24 sps:$4 sm:$0xff] (!%p196_p10)   ;;  %v2508_v4 = vld [vmem:[%s3574_s1 + $0x30] ss:$24 sps:$4 sm:$0xff] (!%p196_p10)   ;;  %vm474_vm0 = vcmask (!%p196_p10), 523264  }
  0x10   : > { %499 = vmatprep.subr.bf16.mxu0 (!%p196_p10), %v2503_v0  ;;  %2325 = vmatprep.subr.bf16.mxu1 (!%p196_p10), %v2503_v0  ;;  %v2509_v5 = vld [vmem:[%s3574_s1 + $0x64] ss:$24 sps:$4 sm:$0xff] (!%p196_p10)   ;;  %v2511_v6 = vld [vmem:[%s3574_s1 + $0x60] ss:$24 sps:$4 sm:$0xff] (!%p196_p10)   ;;  %v2512_v7 = vld [vmem:[%s3574_s1 + $0x94] ss:$24 sps:$4 sm:$0xff] (!%p196_p10)  }
  0x11   : > { %500 = vmatpush1.bf16.msra.mxu0 (!%p196_p10), %v2505_v1  ;;  %2329 = vmatpush1.bf16.msra.mxu1 (!%p196_p10), %v2505_v1  ;;  %v2514_v8 = vld [vmem:[%s3574_s1 + $0x90] ss:$24 sps:$4 sm:$0xff] (!%p196_p10)   ;;  %v2518_v9 = vld [vmem:[%s3574_s1 + $0x14] ss:$24 sps:$4 sm:$0xff] (!%p196_p10)   ;;  %v2523_v13 = vld [vmem:[%s3574_s1 + $0x44] ss:$24 sps:$4 sm:$0xff] (!%p196_p10)  }
  0x12   : > { %501 = vmatprep.subr.bf16.mxu0 (!%p196_p10), %v2506_v3  ;;  %2326 = vmatprep.subr.bf16.mxu1 (!%p196_p10), %v2506_v3  ;;  %v2516_v12 = vld [vmem:[%s3574_s1 + $0x10] ss:$24 sps:$4 sm:$0xff] (!%p196_p10)   ;;  %v2521_v14 = vld [vmem:[%s3574_s1 + $0x40] ss:$24 sps:$4 sm:$0xff] (!%p196_p10)   ;;  %v2537_v16 = vld [vmem:[%s3574_s1 + $0xc] ss:$24 sps:$4 sm:$0xff] (!%p196_p10)  }
  0x13   : > { %v2535_v15 = vld [vmem:[%s3574_s1 + $0x8] ss:$24 sps:$4 sm:$0xff] (!%p196_p10)   ;;  %v2528_v17 = vld [vmem:[%s3574_s1 + $0x74] ss:$24 sps:$4 sm:$0xff] (!%p196_p10)   ;;  %v2533_v22 = vld [vmem:[%s3574_s1 + $0xa4] ss:$24 sps:$4 sm:$0xff] (!%p196_p10)  }
  0x14   : > { %v2540_v18 = vld [vmem:[%s3574_s1 + $0x3c] ss:$24 sps:$4 sm:$0xff] (!%p196_p10)   ;;  %v2526_v21 = vld [vmem:[%s3574_s1 + $0x70] ss:$24 sps:$4 sm:$0xff] (!%p196_p10)   ;;  %v2543_v24 = vld [vmem:[%s3574_s1 + $0x6c] ss:$24 sps:$4 sm:$0xff] (!%p196_p10)  }
  0x15   : > { %502 = vmatpush1.bf16.msra.mxu0 (!%p196_p10), %v2508_v4  ;;  %2330 = vmatpush1.bf16.msra.mxu1 (!%p196_p10), %v2508_v4  ;;  %v2538_v23 = vld [vmem:[%s3574_s1 + $0x38] ss:$24 sps:$4 sm:$0xff] (!%p196_p10)   ;;  %v2541_v26 = vld [vmem:[%s3574_s1 + $0x68] ss:$24 sps:$4 sm:$0xff] (!%p196_p10)   ;;  %v2546_v29 = vld [vmem:[%s3574_s1 + $0x9c] ss:$24 sps:$4 sm:$0xff] (!%p196_p10)  }
  0x16   : > { %s2724_s9 = scalar_select %p244_p11, %s2617_s18, 1  ;;  %503 = vmatprep.subr.bf16.mxu0 %v2509_v5  ;;  %2327 = vmatprep.subr.bf16.mxu1 %v2509_v5  ;;  %v2531_v25 = vld [vmem:[%s3574_s1 + $0xa0] ss:$24 sps:$4 sm:$0xff]   ;;  %vm966_vm1 = vcmask 519168  }
  0x17   : > { %v2544_v30 = vld [vmem:[%s3574_s1 + $0x98] ss:$24 sps:$4 sm:$0xff]   ;;  %s2628_s22 = smov 64   ;;  %s2229_s7 = sshll.u32 %s2617_s18, 11 }
  0x18   : > { %s2130_s14 = sshll.u32 %s2724_s9, 6  ;;  %s3515_s12 = scalar_lea.hbm %s3576_s3, %s2229_s7 }
  0x19   : > { %s2736_s24 = scalar_lea.vmem %s3573_s0, %s2130_s14  ;;  %504 = vmatpush1.bf16.msra.mxu0 %v2511_v6  ;;  %2331 = vmatpush1.bf16.msra.mxu1 %v2511_v6  ;;  %s2629_s13 = smov [#allocation2]  }
  0x1a   : > { %505 = vmatprep.subr.bf16.mxu0 %v2512_v7  ;;  %2328 = vmatprep.subr.bf16.mxu1 %v2512_v7  ;;  %v2515_v10 = vld [vmem:[%s2736_s24] sm:$0xff]   ;;  %v2520_v19 = vld [vmem:[%s2736_s24 + $0x8] sm:$0xff]   ;;  %v2525_v27 = vld [vmem:[%s2736_s24 + $0x10] sm:$0xff]   ;;  %s2551_s14 = sshll.u32 %s2629_s13, 4  ;;  %s2552_s14 = int_to_ptr.vmem [resolvable:$false] %s2551_s14 }
  0x1b   : > { %v2752_v11 = vld [vmem:[%s2736_s24 + $0x20] sm:$0xff]   ;;  %v2524_v20 = vld [vmem:[%s2736_s24 + $0x28] sm:$0xff]   ;;  %v2529_v28 = vld [vmem:[%s2736_s24 + $0x30] sm:$0xff]  }
  0x1c   : > { %v2530_v31 = vld [vmem:[%s2736_s24 + $0x18] sm:$0xff]  }
  0x1d   : > { %506 = vmatpush1.bf16.msra.mxu0 %v2514_v8  ;;  %2332 = vmatpush1.bf16.msra.mxu1 %v2514_v8  ;;  %v2534_v32 = vld [vmem:[%s2736_s24 + $0x38] sm:$0xff]   ;;  %s2131_s24 = sshll.u32 %s2724_s9, 8  ;;  %s229_s9 = sand.u32 1, %s2609_s16  }
  0x1e   : > { %725 = vmatprep.subr.bf16.mxu0 %v2518_v9  ;;  %612 = vmatprep.subr.bf16.mxu1 %v2537_v16  ;;  %s2860_s21 = scalar_lea.vmem %s3575_s2, %s2131_s24  ;;  %s3002_s30 = scalar_lea.vmem %s3577_s4, %s2131_s24 }
  0x1f   : > { %s1846_s5 = sshll.u32 %s229_s9, 7  ;;  %s3523_s18 = scalar_lea.sflag [#allocation3], %s229_s9 }
  0x20   : > { %1885 = vmatmul.mubr.msk.bf16.vlgmr.msra.gmra.mrb[0].mxu0 %vm474_vm0, %v2515_v10  ;;  %1889 = vmatmul.mubr.msk.bf16.vlgmr.msra.gmra.mrb[0].mxu1 %vm474_vm0, %v2752_v11  ;;  %s3476_s6 = scalar_lea.vmem [#allocation2], %s1846_s5 }
  0x21   : > { %726 = vmatpush1.bf16.msra.mxu0 %v2516_v12  ;;  %541 = vmatprep.mubr.bf16.mxu0 %v2627_v2  ;;  %s1685_s8 = sshll.u32 %s3476_s6, 4  ;;  %s3517_s8 = int_to_ptr.vmem [resolvable:$true] %s1685_s8 }
  0x22   : > { %727 = vmatprep.subr.bf16.mxu0 %v2523_v13  ;;  %581 = vmatprep.mubr.bf16.mxu1 %v2627_v2  ;;  %s2547_s24 = scalar_lea.vmem %s3517_s8, 2048  ;;  %p2554_p1 = scmp.lt.s32.totalorder %s3517_s8, %s2552_s14 }
  0x23   : > { %613 = vmatpush1.bf16.msra.mxu1 %v2535_v15  ;;  %p2548_p12 = scmp.ne.s32.totalorder %s3517_s8, %s2547_s24 }
  0x24   : > { %614 = vmatprep.subr.bf16.mxu1 %v2540_v18 }
  0x25   : > { %728 = vmatpush1.bf16.msra.mxu0 %v2521_v14  ;;  %p2549_p13 = pnand %p2548_p12, %p2696_p4 }
  0x26   : > { %729 = vmatprep.subr.bf16.mxu0 %v2528_v17 }
  0x27   : > { %615 = vmatpush1.bf16.msra.mxu1 %v2538_v23  ;;  %p2550_p0 = pneg %p2549_p13 }
  0x28   : > { %1886 = vmatmul.mubr.msk.bf16.gmra.mrb[4].mxu0 %vm474_vm0, %v2520_v19  ;;  %1890 = vmatmul.mubr.msk.bf16.gmra.mrb[4].mxu1 %vm474_vm0, %v2524_v20 }
  0x29   : > { %551 = vmatprep.mubr.bf16.mxu0 %v2627_v2  ;;  %730 = vmatpush1.bf16.msra.mxu0 %v2526_v21 }
  0x2a   : > { %591 = vmatprep.mubr.bf16.mxu1 %v2627_v2  ;;  %731 = vmatprep.subr.bf16.mxu0 %v2533_v22 }
  0x2b   : > { %616 = vmatprep.subr.bf16.mxu1 %v2543_v24 }
  0x2c   : > { %617 = vmatpush1.bf16.msra.mxu1 %v2541_v26 }
  0x2d   : > { %732 = vmatpush1.bf16.msra.mxu0 %v2531_v25  ;;  %618 = vmatprep.subr.bf16.mxu1 %v2546_v29 }
  0x30   : > { %1887 = vmatmul.mubr.msk.bf16.gmra.mrb[8].mxu0 %vm474_vm0, %v2525_v27  ;;  %1891 = vmatmul.mubr.msk.bf16.gmra.mrb[8].mxu1 %vm474_vm0, %v2529_v28 }
  0x31   : > { %561 = vmatprep.mubr.bf16.mxu0 %v2627_v2  ;;  %601 = vmatprep.mubr.bf16.mxu1 %v2627_v2 }
  0x32   : > { %619 = vmatpush1.bf16.msra.mxu1 %v2544_v30 }
  0x38   : > { %1888 = vmatmul.mubr.msk.bf16.gmra.mrb[12].mxu0 %vm474_vm0, %v2530_v31  ;;  %1892 = vmatmul.mubr.msk.bf16.gmra.mrb[12].mxu1 %vm474_vm0, %v2534_v32 }
  0x39   : > { %757 = vmatprep.mubr.bf16.mxu0 %v2627_v2  ;;  %644 = vmatprep.mubr.bf16.mxu1 %v2627_v2 }
  0x40   : > { %1901 = vmatmul.mubr.msk.bf16.vlgmr.msra.gmra.mrb[16].mxu0 %vm474_vm0, %v2515_v10  ;;  %1893 = vmatmul.mubr.msk.bf16.vlgmr.msra.gmra.mrb[16].mxu1 %vm474_vm0, %v2515_v10 }
  0x41   : > { %767 = vmatprep.mubr.bf16.mxu0 %v2627_v2  ;;  %654 = vmatprep.mubr.bf16.mxu1 %v2627_v2 }
  0x48   : > { %1902 = vmatmul.mubr.msk.bf16.gmra.mrb[20].mxu0 %vm474_vm0, %v2520_v19  ;;  %1894 = vmatmul.mubr.msk.bf16.gmra.mrb[20].mxu1 %vm474_vm0, %v2520_v19 }
  0x49   : > { %777 = vmatprep.mubr.bf16.mxu0 %v2627_v2  ;;  %664 = vmatprep.mubr.bf16.mxu1 %v2627_v2 }
  0x50   : > { %1903 = vmatmul.mubr.msk.bf16.gmra.mrb[24].mxu0 %vm474_vm0, %v2525_v27  ;;  %1895 = vmatmul.mubr.msk.bf16.gmra.mrb[24].mxu1 %vm474_vm0, %v2525_v27 }
  0x51   : > { %787 = vmatprep.mubr.bf16.mxu0 %v2627_v2  ;;  %674 = vmatprep.mubr.bf16.mxu1 %v2627_v2 }
  0x58   : > { %1904 = vmatmul.mubr.msk.bf16.gmra.mrb[28].mxu0 %vm474_vm0, %v2530_v31  ;;  %1896 = vmatmul.mubr.msk.bf16.gmra.mrb[28].mxu1 %vm474_vm0, %v2530_v31 }
  0x59   : > { %797 = vmatprep.mubr.bf16.mxu0 %v2627_v2  ;;  %684 = vmatprep.mubr.bf16.mxu1 %v2627_v2 }
  0x60   : > { %1905 = vmatmul.mubr.msk.bf16.gmra.mrb[32].mxu0 %vm474_vm0, %v2752_v11  ;;  %1897 = vmatmul.mubr.msk.bf16.gmra.mrb[32].mxu1 %vm474_vm0, %v2752_v11 }
  0x61   : > { %807 = vmatprep.mubr.bf16.mxu0 %v2627_v2  ;;  %694 = vmatprep.mubr.bf16.mxu1 %v2627_v2 }
  0x68   : > { %1906 = vmatmul.mubr.msk.bf16.gmra.mrb[36].mxu0 %vm474_vm0, %v2524_v20  ;;  %1898 = vmatmul.mubr.msk.bf16.gmra.mrb[36].mxu1 %vm474_vm0, %v2524_v20 }
  0x69   : > { %817 = vmatprep.mubr.bf16.mxu0 %v2627_v2  ;;  %704 = vmatprep.mubr.bf16.mxu1 %v2627_v2 }
  0x70   : > { %1907 = vmatmul.mubr.msk.bf16.gmra.mrb[40].mxu0 %vm474_vm0, %v2529_v28  ;;  %1899 = vmatmul.mubr.msk.bf16.gmra.mrb[40].mxu1 %vm474_vm0, %v2529_v28 }
  0x71   : > { %827 = vmatprep.mubr.bf16.mxu0 %v2627_v2  ;;  %714 = vmatprep.mubr.bf16.mxu1 %v2627_v2 }
  0x78   : > { %1908 = vmatmul.mubr.msk.bf16.gmra.mrb[44].mxu0 %vm474_vm0, %v2534_v32  ;;  %1900 = vmatmul.mubr.msk.bf16.gmra.mrb[44].mxu1 %vm474_vm0, %v2534_v32 }
  0xf3   : > { %v533_v33 = vpop.f32.mrb[0].mxu0  ;;  %v573_v34 = vpop.f32.mrb[0].mxu1 }
  0xf4   : > { %v2133_v35 = vpack.c.bf16 %v533_v33, %v533_v33  ;;  %v535_v36 = vpop.f32.mrb[1].mxu0  ;;  %v2141_v37 = vpack.c.bf16 %v573_v34, %v573_v34  ;;  %v575_v38 = vpop.f32.mrb[1].mxu1 }
  0xf5   : > { %v2181_v39 = vpack.c.bf16 %v535_v36, %v535_v36  ;;  %v537_v40 = vpop.f32.mrb[2].mxu0  ;;  %v2189_v41 = vpack.c.bf16 %v575_v38, %v575_v38  ;;  %v577_v42 = vpop.f32.mrb[2].mxu1 }
  0xf6   : > { %967 = vst.msk [vmem:[%s2860_s21] sm:$0xf] %vm966_vm1, %v2133_v35  ;;  %v2134_v43 = vpack.c.bf16 %v537_v40, %v537_v40  ;;  %1103 = vrot.lane.b32.xlu1 %v2133_v35, %s2628_s22  ;;  %v539_v44 = vpop.f32.mrb[3].mxu0  ;;  %975 = vst.msk [vmem:[%s2860_s21 + $0x20] sm:$0xf] %vm966_vm1, %v2141_v37  ;;  %v2142_v45 = vpack.c.bf16 %v577_v42, %v577_v42  ;;  %v579_v46 = vpop.f32.mrb[3].mxu1 }
  0xf7   : > { %2013 = vst.msk [vmem:[%s2860_s21 + $0x80] sm:$0xf] %vm966_vm1, %v2181_v39  ;;  %v2182_v47 = vpack.c.bf16 %v539_v44, %v539_v44  ;;  %1477 = vrot.lane.b32.xlu0 %v2181_v39, %s2628_s22  ;;  %2021 = vst.msk [vmem:[%s2860_s21 + $0xa0] sm:$0xf] %vm966_vm1, %v2189_v41  ;;  %v2190_v48 = vpack.c.bf16 %v579_v46, %v579_v46 }
  0xf8   : > { %968 = vst.msk [vmem:[%s2860_s21 + $0x4] sm:$0xf] %vm966_vm1, %v2134_v43  ;;  %976 = vst.msk [vmem:[%s2860_s21 + $0x24] sm:$0xf] %vm966_vm1, %v2142_v45 }
  0xf9   : > { %2014 = vst.msk [vmem:[%s2860_s21 + $0x84] sm:$0xf] %vm966_vm1, %v2182_v47  ;;  %2022 = vst.msk [vmem:[%s2860_s21 + $0xa4] sm:$0xf] %vm966_vm1, %v2190_v48 }
  0xfa   : > { %1119 = vrot.lane.b32.xlu1 %v2141_v37, %s2628_s22 }
  0xfb   : > { %1493 = vrot.lane.b32.xlu0 %v2189_v41, %s2628_s22  ;;  %v543_v49 = vpop.f32.mrb[4].mxu0  ;;  %v583_v50 = vpop.f32.mrb[4].mxu1 }
  0xfc   : > { %v2882_v51 = vpack.c.bf16 %v543_v49, %v543_v49  ;;  %v545_v52 = vpop.f32.mrb[5].mxu0  ;;  %v2884_v53 = vpack.c.bf16 %v583_v50, %v583_v50  ;;  %v585_v54 = vpop.f32.mrb[5].mxu1 }
  0xfd   : > { %v2183_v55 = vpack.c.bf16 %v545_v52, %v545_v52  ;;  %v547_v56 = vpop.f32.mrb[6].mxu0  ;;  %v2191_v57 = vpack.c.bf16 %v585_v54, %v585_v54  ;;  %v587_v58 = vpop.f32.mrb[6].mxu1 }
  0xfe   : > { %969 = vst.msk [vmem:[%s2860_s21 + $0x8] sm:$0xf] %vm966_vm1, %v2882_v51  ;;  %v2889_v59 = vpack.c.bf16 %v547_v56, %v547_v56  ;;  %1105 = vrot.lane.b32.xlu1 %v2134_v43, %s2628_s22  ;;  %v549_v60 = vpop.f32.mrb[7].mxu0  ;;  %977 = vst.msk [vmem:[%s2860_s21 + $0x28] sm:$0xf] %vm966_vm1, %v2884_v53  ;;  %v2895_v61 = vpack.c.bf16 %v587_v58, %v587_v58  ;;  %v589_v62 = vpop.f32.mrb[7].mxu1 }
  0xff   : > { %2015 = vst.msk [vmem:[%s2860_s21 + $0x88] sm:$0xf] %vm966_vm1, %v2183_v55  ;;  %v2899_v63 = vpack.c.bf16 %v549_v60, %v549_v60  ;;  %1481 = vrot.lane.b32.xlu0 %v2183_v55, %s2628_s22  ;;  %2023 = vst.msk [vmem:[%s2860_s21 + $0xa8] sm:$0xf] %vm966_vm1, %v2191_v57  ;;  %v2904_v0 = vpack.c.bf16 %v589_v62, %v589_v62 }
 0x100   : > { %970 = vst.msk [vmem:[%s2860_s21 + $0xc] sm:$0xf] %vm966_vm1, %v2889_v59  ;;  %978 = vst.msk [vmem:[%s2860_s21 + $0x2c] sm:$0xf] %vm966_vm1, %v2895_v61 }
 0x101   : > { %2016 = vst.msk [vmem:[%s2860_s21 + $0x8c] sm:$0xf] %vm966_vm1, %v2899_v63  ;;  %2024 = vst.msk [vmem:[%s2860_s21 + $0xac] sm:$0xf] %vm966_vm1, %v2904_v0 }
 0x102   : > { %1121 = vrot.lane.b32.xlu1 %v2142_v45, %s2628_s22 }
 0x103   : > { %1497 = vrot.lane.b32.xlu0 %v2191_v57, %s2628_s22  ;;  %v553_v1 = vpop.f32.mrb[8].mxu0  ;;  %v593_v2 = vpop.f32.mrb[8].mxu1 }
 0x104   : > { %v2920_v3 = vpack.c.bf16 %v553_v1, %v553_v1  ;;  %v555_v4 = vpop.f32.mrb[9].mxu0  ;;  %v2922_v5 = vpack.c.bf16 %v593_v2, %v593_v2  ;;  %v595_v6 = vpop.f32.mrb[9].mxu1 }
 0x105   : > { %v2185_v7 = vpack.c.bf16 %v555_v4, %v555_v4  ;;  %v557_v8 = vpop.f32.mrb[10].mxu0  ;;  %v2193_v9 = vpack.c.bf16 %v595_v6, %v595_v6  ;;  %v597_v10 = vpop.f32.mrb[10].mxu1 }
 0x106   : > { %971 = vst.msk [vmem:[%s2860_s21 + $0x10] sm:$0xf] %vm966_vm1, %v2920_v3  ;;  %v2927_v11 = vpack.c.bf16 %v557_v8, %v557_v8  ;;  %1479 = vrot.lane.b32.xlu1 %v2182_v47, %s2628_s22  ;;  %v559_v12 = vpop.f32.mrb[11].mxu0  ;;  %979 = vst.msk [vmem:[%s2860_s21 + $0x30] sm:$0xf] %vm966_vm1, %v2922_v5  ;;  %v2933_v13 = vpack.c.bf16 %v597_v10, %v597_v10  ;;  %v599_v14 = vpop.f32.mrb[11].mxu1 }
 0x107   : > { %2017 = vst.msk [vmem:[%s2860_s21 + $0x90] sm:$0xf] %vm966_vm1, %v2185_v7  ;;  %v2937_v15 = vpack.c.bf16 %v559_v12, %v559_v12  ;;  %1485 = vrot.lane.b32.xlu0 %v2185_v7, %s2628_s22  ;;  %2025 = vst.msk [vmem:[%s2860_s21 + $0xb0] sm:$0xf] %vm966_vm1, %v2193_v9  ;;  %v2942_v16 = vpack.c.bf16 %v599_v14, %v599_v14 }
 0x108   : > { %972 = vst.msk [vmem:[%s2860_s21 + $0x14] sm:$0xf] %vm966_vm1, %v2927_v11  ;;  %980 = vst.msk [vmem:[%s2860_s21 + $0x34] sm:$0xf] %vm966_vm1, %v2933_v13 }
 0x109   : > { %2018 = vst.msk [vmem:[%s2860_s21 + $0x94] sm:$0xf] %vm966_vm1, %v2937_v15  ;;  %2026 = vst.msk [vmem:[%s2860_s21 + $0xb4] sm:$0xf] %vm966_vm1, %v2942_v16 }
 0x10a   : > { %1495 = vrot.lane.b32.xlu1 %v2190_v48, %s2628_s22 }
 0x10b   : > { %1501 = vrot.lane.b32.xlu0 %v2193_v9, %s2628_s22  ;;  %v563_v17 = vpop.f32.mrb[12].mxu0  ;;  %v603_v18 = vpop.f32.mrb[12].mxu1 }
 0x10c   : > { %v2958_v19 = vpack.c.bf16 %v563_v17, %v563_v17  ;;  %v565_v20 = vpop.f32.mrb[13].mxu0  ;;  %v2960_v21 = vpack.c.bf16 %v603_v18, %v603_v18  ;;  %v605_v22 = vpop.f32.mrb[13].mxu1 }
 0x10d   : > { %v2187_v23 = vpack.c.bf16 %v565_v20, %v565_v20  ;;  %v567_v24 = vpop.f32.mrb[14].mxu0  ;;  %v2195_v25 = vpack.c.bf16 %v605_v22, %v605_v22  ;;  %v607_v26 = vpop.f32.mrb[14].mxu1 }
 0x10e   : > { %973 = vst.msk [vmem:[%s2860_s21 + $0x18] sm:$0xf] %vm966_vm1, %v2958_v19  ;;  %v2965_v27 = vpack.c.bf16 %v567_v24, %v567_v24  ;;  %1107 = vrot.lane.b32.xlu1 %v2882_v51, %s2628_s22  ;;  %v569_v28 = vpop.f32.mrb[15].mxu0  ;;  %981 = vst.msk [vmem:[%s2860_s21 + $0x38] sm:$0xf] %vm966_vm1, %v2960_v21  ;;  %v2972_v29 = vpack.c.bf16 %v607_v26, %v607_v26  ;;  %v609_v30 = vpop.f32.mrb[15].mxu1 }
 0x10f   : > { %2019 = vst.msk [vmem:[%s2860_s21 + $0x98] sm:$0xf] %vm966_vm1, %v2187_v23  ;;  %v2976_v31 = vpack.c.bf16 %v569_v28, %v569_v28  ;;  %1489 = vrot.lane.b32.xlu0 %v2187_v23, %s2628_s22  ;;  %2027 = vst.msk [vmem:[%s2860_s21 + $0xb8] sm:$0xf] %vm966_vm1, %v2195_v25  ;;  %v2981_v32 = vpack.c.bf16 %v609_v30, %v609_v30 }
 0x110   : > { %974 = vst.msk [vmem:[%s2860_s21 + $0x1c] sm:$0xf] %vm966_vm1, %v2965_v27  ;;  %982 = vst.msk [vmem:[%s2860_s21 + $0x3c] sm:$0xf] %vm966_vm1, %v2972_v29 }
 0x111   : > { %2020 = vst.msk [vmem:[%s2860_s21 + $0x9c] sm:$0xf] %vm966_vm1, %v2976_v31  ;;  %2028 = vst.msk [vmem:[%s2860_s21 + $0xbc] sm:$0xf] %vm966_vm1, %v2981_v32 }
 0x112   : > { %1123 = vrot.lane.b32.xlu1 %v2884_v53, %s2628_s22 }
 0x113   : > { %1505 = vrot.lane.b32.xlu0 %v2195_v25, %s2628_s22  ;;  %v759_v33 = vpop.f32.mrb[16].mxu0  ;;  %v3005_v34 = vpop.f32.mrb[16].mxu1 }
 0x114   : > { %v2157_v35 = vpack.c.bf16 %v759_v33, %v759_v33  ;;  %v761_v36 = vpop.f32.mrb[17].mxu0  ;;  %v3007_v37 = vpop.f32.mrb[17].mxu1 }
 0x115   : > { %v2205_v38 = vpack.c.bf16 %v761_v36, %v761_v36  ;;  %v763_v39 = vpop.f32.mrb[18].mxu0  ;;  %v2391_v40 = vpack.i.bf16 %v3007_v37, %v3005_v34  ;;  %v3011_v41 = vpop.f32.mrb[18].mxu1 }
 0x116   : > { %1087 = vst.msk [vmem:[%s3002_s30] sm:$0xf] %vm966_vm1, %v2157_v35  ;;  %v3015_v42 = vpack.c.bf16 %v763_v39, %v763_v39  ;;  %1109 = vrot.lane.b32.xlu1 %v2889_v59, %s2628_s22  ;;  %v765_v43 = vpop.f32.mrb[19].mxu0  ;;  %v3019_v44 = vpop.f32.mrb[19].mxu1 }
 0x117   : > { %2061 = vst.msk [vmem:[%s3002_s30 + $0x80] sm:$0xf] %vm966_vm1, %v2205_v38  ;;  %v3023_v45 = vpack.c.bf16 %v765_v43, %v765_v43  ;;  %1209 = vrot.lane.b32.xlu0 %v2157_v35, %s2628_s22  ;;  %v2393_v46 = vpack.i.bf16 %v3019_v44, %v3011_v41 }
 0x118   : > { %1088 = vst.msk [vmem:[%s3002_s30 + $0x4] sm:$0xf] %vm966_vm1, %v3015_v42 }
 0x119   : > { %2062 = vst.msk [vmem:[%s3002_s30 + $0x84] sm:$0xf] %vm966_vm1, %v3023_v45 }
 0x11a   : > { %1125 = vrot.lane.b32.xlu1 %v2895_v61, %s2628_s22 }
 0x11b   : > { %1583 = vrot.lane.b32.xlu0 %v2205_v38, %s2628_s22  ;;  %v769_v47 = vpop.f32.mrb[20].mxu0  ;;  %v3037_v48 = vpop.f32.mrb[20].mxu1 }
 0x11c   : > { %v3039_v49 = vpack.c.bf16 %v769_v47, %v769_v47  ;;  %v771_v50 = vpop.f32.mrb[21].mxu0  ;;  %v3041_v51 = vpop.f32.mrb[21].mxu1 }
 0x11d   : > { %v2207_v52 = vpack.c.bf16 %v771_v50, %v771_v50  ;;  %v773_v53 = vpop.f32.mrb[22].mxu0  ;;  %v2395_v54 = vpack.i.bf16 %v3041_v51, %v3037_v48  ;;  %v3045_v55 = vpop.f32.mrb[22].mxu1 }
 0x11e   : > { %1089 = vst.msk [vmem:[%s3002_s30 + $0x8] sm:$0xf] %vm966_vm1, %v3039_v49  ;;  %v3050_v56 = vpack.c.bf16 %v773_v53, %v773_v53  ;;  %1483 = vrot.lane.b32.xlu1 %v2899_v63, %s2628_s22  ;;  %v775_v57 = vpop.f32.mrb[23].mxu0  ;;  %v3054_v58 = vpop.f32.mrb[23].mxu1 }
 0x11f   : > { %2063 = vst.msk [vmem:[%s3002_s30 + $0x88] sm:$0xf] %vm966_vm1, %v2207_v52  ;;  %v3058_v59 = vpack.c.bf16 %v775_v57, %v775_v57  ;;  %1587 = vrot.lane.b32.xlu0 %v2207_v52, %s2628_s22  ;;  %v2397_v60 = vpack.i.bf16 %v3054_v58, %v3045_v55 }
 0x120   : > { %1090 = vst.msk [vmem:[%s3002_s30 + $0xc] sm:$0xf] %vm966_vm1, %v3050_v56 }
 0x121   : > { %2064 = vst.msk [vmem:[%s3002_s30 + $0x8c] sm:$0xf] %vm966_vm1, %v3058_v59 }
 0x122   : > { %1499 = vrot.lane.b32.xlu1 %v2904_v0, %s2628_s22 }
 0x123   : > { %v779_v61 = vpop.f32.mrb[24].mxu0  ;;  %v3071_v62 = vpop.f32.mrb[24].mxu1 }
 0x124   : > { %v3073_v63 = vpack.c.bf16 %v779_v61, %v779_v61  ;;  %v781_v1 = vpop.f32.mrb[25].mxu0  ;;  %v3075_v2 = vpop.f32.mrb[25].mxu1 }
 0x125   : > { %v2209_v4 = vpack.c.bf16 %v781_v1, %v781_v1  ;;  %v783_v6 = vpop.f32.mrb[26].mxu0  ;;  %v3079_v8 = vpop.f32.mrb[26].mxu1  ;;  %v3580_v48 = vpack.i.bf16 %v3075_v2, %v3071_v62 }
 0x126   : > { %1091 = vst.msk [vmem:[%s3002_s30 + $0x10] sm:$0xf] %vm966_vm1, %v3073_v63  ;;  %v3084_v0 = vpack.c.bf16 %v783_v6, %v783_v6  ;;  %1111 = vrot.lane.b32.xlu1 %v2920_v3, %s2628_s22  ;;  %v785_v9 = vpop.f32.mrb[27].mxu0  ;;  %v3088_v10 = vpop.f32.mrb[27].mxu1 }
 0x127   : > { %2065 = vst.msk [vmem:[%s3002_s30 + $0x90] sm:$0xf] %vm966_vm1, %v2209_v4  ;;  %v3092_v12 = vpack.c.bf16 %v785_v9, %v785_v9  ;;  %1591 = vrot.lane.b32.xlu0 %v2209_v4, %s2628_s22  ;;  %v3581_v55 = vpack.i.bf16 %v3088_v10, %v3079_v8 }
 0x128   : > { %1092 = vst.msk [vmem:[%s3002_s30 + $0x14] sm:$0xf] %vm966_vm1, %v3084_v0 }
 0x129   : > { %2066 = vst.msk [vmem:[%s3002_s30 + $0x94] sm:$0xf] %vm966_vm1, %v3092_v12 }
 0x12a   : > { %1127 = vrot.lane.b32.xlu1 %v2922_v5, %s2628_s22 }
 0x12b   : > { %v789_v3 = vpop.f32.mrb[28].mxu0  ;;  %v3105_v17 = vpop.f32.mrb[28].mxu1 }
 0x12c   : > { %v3107_v18 = vpack.c.bf16 %v789_v3, %v789_v3  ;;  %v791_v20 = vpop.f32.mrb[29].mxu0  ;;  %v3109_v22 = vpop.f32.mrb[29].mxu1 }
 0x12d   : > { %v2211_v23 = vpack.c.bf16 %v791_v20, %v791_v20  ;;  %v793_v24 = vpop.f32.mrb[30].mxu0  ;;  %v3113_v26 = vpop.f32.mrb[30].mxu1 }
 0x12e   : > { %1093 = vst.msk [vmem:[%s3002_s30 + $0x18] sm:$0xf] %vm966_vm1, %v3107_v18  ;;  %v3118_v5 = vpack.c.bf16 %v793_v24, %v793_v24  ;;  %1113 = vrot.lane.b32.xlu1 %v2927_v11, %s2628_s22  ;;  %v795_v28 = vpop.f32.mrb[31].mxu0  ;;  %v3122_v30 = vpop.f32.mrb[31].mxu1 }
 0x12f   : > { %2067 = vst.msk [vmem:[%s3002_s30 + $0x98] sm:$0xf] %vm966_vm1, %v2211_v23  ;;  %v3126_v33 = vpack.c.bf16 %v795_v28, %v795_v28  ;;  %1595 = vrot.lane.b32.xlu0 %v2211_v23, %s2628_s22 }
 0x130   : > { %1094 = vst.msk [vmem:[%s3002_s30 + $0x1c] sm:$0xf] %vm966_vm1, %v3118_v5 }
 0x131   : > { %2068 = vst.msk [vmem:[%s3002_s30 + $0x9c] sm:$0xf] %vm966_vm1, %v3126_v33 }
 0x132   : > { %1129 = vrot.lane.b32.xlu1 %v2933_v13, %s2628_s22 }
 0x133   : > { %v799_v11 = vpop.f32.mrb[32].mxu0  ;;  %v3139_v36 = vpop.f32.mrb[32].mxu1 }
 0x134   : > { %v3141_v38 = vpack.c.bf16 %v799_v11, %v799_v11  ;;  %v801_v39 = vpop.f32.mrb[33].mxu0  ;;  %v3143_v43 = vpop.f32.mrb[33].mxu1 }
 0x135   : > { %v2213_v47 = vpack.c.bf16 %v801_v39, %v801_v39  ;;  %v803_v50 = vpop.f32.mrb[34].mxu0  ;;  %v3147_v53 = vpop.f32.mrb[34].mxu1 }
 0x136   : > { %1095 = vst.msk [vmem:[%s3002_s30 + $0x20] sm:$0xf] %vm966_vm1, %v3141_v38  ;;  %v3152_v13 = vpack.c.bf16 %v803_v50, %v803_v50  ;;  %1487 = vrot.lane.b32.xlu1 %v2937_v15, %s2628_s22  ;;  %v805_v57 = vpop.f32.mrb[35].mxu0  ;;  %v3156_v61 = vpop.f32.mrb[35].mxu1 }
 0x137   : > { %2069 = vst.msk [vmem:[%s3002_s30 + $0xa0] sm:$0xf] %vm966_vm1, %v2213_v47  ;;  %v3160_v1 = vpack.c.bf16 %v805_v57, %v805_v57  ;;  %1599 = vrot.lane.b32.xlu0 %v2213_v47, %s2628_s22 }
 0x138   : > { %1096 = vst.msk [vmem:[%s3002_s30 + $0x24] sm:$0xf] %vm966_vm1, %v3152_v13 }
 0x139   : > { %2070 = vst.msk [vmem:[%s3002_s30 + $0xa4] sm:$0xf] %vm966_vm1, %v3160_v1 }
 0x13a   : > { %1503 = vrot.lane.b32.xlu1 %v2942_v16, %s2628_s22 }
 0x13b   : > { %v809_v15 = vpop.f32.mrb[36].mxu0  ;;  %v3173_v6 = vpop.f32.mrb[36].mxu1 }
 0x13c   : > { %v3175_v9 = vpack.c.bf16 %v809_v15, %v809_v15  ;;  %v811_v3 = vpop.f32.mrb[37].mxu0  ;;  %v3177_v20 = vpop.f32.mrb[37].mxu1 }
 0x13d   : > { %v2215_v23 = vpack.c.bf16 %v811_v3, %v811_v3  ;;  %v813_v24 = vpop.f32.mrb[38].mxu0  ;;  %v3181_v11 = vpop.f32.mrb[38].mxu1 }
 0x13e   : > { %1097 = vst.msk [vmem:[%s3002_s30 + $0x28] sm:$0xf] %vm966_vm1, %v3175_v9  ;;  %v3186_v16 = vpack.c.bf16 %v813_v24, %v813_v24  ;;  %1115 = vrot.lane.b32.xlu1 %v2958_v19, %s2628_s22  ;;  %v815_v39 = vpop.f32.mrb[39].mxu0  ;;  %v3190_v47 = vpop.f32.mrb[39].mxu1 }
 0x13f   : > { %2071 = vst.msk [vmem:[%s3002_s30 + $0xa8] sm:$0xf] %vm966_vm1, %v2215_v23  ;;  %v3194_v50 = vpack.c.bf16 %v815_v39, %v815_v39  ;;  %1603 = vrot.lane.b32.xlu0 %v2215_v23, %s2628_s22 }
 0x140   : > { %1098 = vst.msk [vmem:[%s3002_s30 + $0x2c] sm:$0xf] %vm966_vm1, %v3186_v16 }
 0x141   : > { %2072 = vst.msk [vmem:[%s3002_s30 + $0xac] sm:$0xf] %vm966_vm1, %v3194_v50 }
 0x142   : > { %1131 = vrot.lane.b32.xlu1 %v2960_v21, %s2628_s22 }
 0x143   : > { %v819_v19 = vpop.f32.mrb[40].mxu0  ;;  %v3207_v15 = vpop.f32.mrb[40].mxu1 }
 0x144   : > { %v2169_v3 = vpack.c.bf16 %v819_v19, %v819_v19  ;;  %v821_v24 = vpop.f32.mrb[41].mxu0  ;;  %v3209_v23 = vpop.f32.mrb[41].mxu1 }
 0x145   : > { %v2217_v39 = vpack.c.bf16 %v821_v24, %v821_v24  ;;  %v823_v57 = vpop.f32.mrb[42].mxu0  ;;  %v3213_v4 = vpop.f32.mrb[42].mxu1 }
 0x146   : > { %1099 = vst.msk [vmem:[%s3002_s30 + $0x30] sm:$0xf] %vm966_vm1, %v2169_v3  ;;  %v3217_v21 = vpack.c.bf16 %v823_v57, %v823_v57  ;;  %1117 = vrot.lane.b32.xlu1 %v2965_v27, %s2628_s22  ;;  %1233 = vrot.lane.b32.xlu0 %v2169_v3, %s2628_s22  ;;  %v825_v19 = vpop.f32.mrb[43].mxu0  ;;  %v3222_v52 = vpop.f32.mrb[43].mxu1 }
 0x147   : > { %2073 = vst.msk [vmem:[%s3002_s30 + $0xb0] sm:$0xf] %vm966_vm1, %v2217_v39  ;;  %v3226_v24 = vpack.c.bf16 %v825_v19, %v825_v19 }
 0x148   : > { %1100 = vst.msk [vmem:[%s3002_s30 + $0x34] sm:$0xf] %vm966_vm1, %v3217_v21 }
 0x149   : > { %2074 = vst.msk [vmem:[%s3002_s30 + $0xb4] sm:$0xf] %vm966_vm1, %v3226_v24 }
 0x14a   : > { %1133 = vrot.lane.b32.xlu1 %v2972_v29, %s2628_s22  ;;  %1607 = vrot.lane.b32.xlu0 %v2217_v39, %s2628_s22 }
 0x14b   : > { %v829_v27 = vpop.f32.mrb[44].mxu0  ;;  %v3239_v57 = vpop.f32.mrb[44].mxu1 }
 0x14c   : > { %v2171_v3 = vpack.c.bf16 %v829_v27, %v829_v27  ;;  %v831_v19 = vpop.f32.mrb[45].mxu0  ;;  %v3241_v28 = vpop.f32.mrb[45].mxu1 }
 0x14d   : > { %v3243_v35 = vpack.c.bf16 %v831_v19, %v831_v19  ;;  %v833_v25 = vpop.f32.mrb[46].mxu0  ;;  %v3247_v7 = vpop.f32.mrb[46].mxu1 }
 0x14e   : > { %1101 = vst.msk [vmem:[%s3002_s30 + $0x38] sm:$0xf] %vm966_vm1, %v2171_v3  ;;  %v3251_v29 = vpack.c.bf16 %v833_v25, %v833_v25  ;;  %1491 = vrot.lane.b32.xlu1 %v2976_v31, %s2628_s22  ;;  %1237 = vrot.lane.b32.xlu0 %v2171_v3, %s2628_s22  ;;  %v835_v39 = vpop.f32.mrb[47].mxu0  ;;  %v3256_v27 = vpop.f32.mrb[47].mxu1  ;;  %v3586_v25 = vpack.i.bf16 %v3177_v20, %v3173_v6 }
 0x14f   : > { %2075 = vst.msk [vmem:[%s3002_s30 + $0xb8] sm:$0xf] %vm966_vm1, %v3243_v35  ;;  %v3261_v19 = vpack.c.bf16 %v835_v39, %v835_v39  ;;  %v2421_v14 = vpack.i.bf16 %v3256_v27, %v3247_v7 }
 0x150   : > { %1102 = vst.msk [vmem:[%s3002_s30 + $0x3c] sm:$0xf] %vm966_vm1, %v3251_v29 }
 0x151   : > { %2076 = vst.msk [vmem:[%s3002_s30 + $0xbc] sm:$0xf] %vm966_vm1, %v3261_v19 }
 0x152   : > { %1507 = vrot.lane.b32.xlu1 %v2981_v32, %s2628_s22 }
 0x156   : > { %1211 = vrot.lane.b32.xlu1 %v3015_v42, %s2628_s22 }
 0x15a   : > { %1585 = vrot.lane.b32.xlu1 %v3023_v45, %s2628_s22 }
 0x15e   : > { %1213 = vrot.lane.b32.xlu1 %v3039_v49, %s2628_s22 }
 0x162   : > { %1215 = vrot.lane.b32.xlu1 %v3050_v56, %s2628_s22 }
 0x166   : > { %1589 = vrot.lane.b32.xlu1 %v3058_v59, %s2628_s22  ;;  %v3582_v59 = vpack.i.bf16 %v3109_v22, %v3105_v17  ;;  %v3585_v17 = vpack.i.bf16 %v3156_v61, %v3147_v53  ;;  %v3590_v61 = vpack.i.bf16 %v3241_v28, %v3239_v57 }
 0x168   : > { %v1104_v31 = vpop.permute.xlu1 %1103 }
 0x169   : > { %1949 = vst.msk [vmem:[%s2860_s21 + $0x40] sm:$0xf] %vm966_vm1, %v1104_v31  ;;  %v1478_v32 = vpop.permute.xlu0 %1477 }
 0x16a   : > { %2077 = vst.msk [vmem:[%s2860_s21 + $0xc0] sm:$0xf] %vm966_vm1, %v1478_v32  ;;  %1217 = vrot.lane.b32.xlu1 %v3073_v63, %s2628_s22  ;;  %v3583_v63 = vpack.i.bf16 %v3122_v30, %v3113_v26 }
 0x16c   : > { %v1120_v42 = vpop.permute.xlu1 %1119  ;;  %2392 = vxpose.xlu0.b32.start [1/16] %v2391_v40, 128 }
 0x16d   : > { %1957 = vst.msk [vmem:[%s2860_s21 + $0x60] sm:$0xf] %vm966_vm1, %v1120_v42  ;;  %v1494_v45 = vpop.permute.xlu0 %1493 }
 0x16e   : > { %2085 = vst.msk [vmem:[%s2860_s21 + $0xe0] sm:$0xf] %vm966_vm1, %v1494_v45  ;;  %1219 = vrot.lane.b32.xlu1 %v3084_v0, %s2628_s22  ;;  %v3584_v0 = vpack.i.bf16 %v3143_v43, %v3139_v36  ;;  %v3588_v36 = vpack.i.bf16 %v3209_v23, %v3207_v15  ;;  %v3589_v43 = vpack.i.bf16 %v3222_v52, %v3213_v4 }
 0x170   : > { %v1106_v49 = vpop.permute.xlu1 %1105  ;;  %2394 = vxpose.xlu0.b32.cont [2/16] %v2393_v46, 128 }
 0x171   : > { %1950 = vst.msk [vmem:[%s2860_s21 + $0x44] sm:$0xf] %vm966_vm1, %v1106_v49  ;;  %v1482_v34 = vpop.permute.xlu0 %1481 }
 0x172   : > { %2079 = vst.msk [vmem:[%s2860_s21 + $0xc8] sm:$0xf] %vm966_vm1, %v1482_v34  ;;  %1593 = vrot.lane.b32.xlu1 %v3092_v12, %s2628_s22 }
 0x174   : > { %v1122_v37 = vpop.permute.xlu1 %1121  ;;  %2396 = vxpose.xlu0.b32.cont [3/16] %v2395_v54, 128 }
 0x175   : > { %1958 = vst.msk [vmem:[%s2860_s21 + $0x64] sm:$0xf] %vm966_vm1, %v1122_v37  ;;  %v1498_v40 = vpop.permute.xlu0 %1497 }
 0x176   : > { %2087 = vst.msk [vmem:[%s2860_s21 + $0xe8] sm:$0xf] %vm966_vm1, %v1498_v40  ;;  %1221 = vrot.lane.b32.xlu1 %v3107_v18, %s2628_s22 }
 0x178   : > { %v1480_v41 = vpop.permute.xlu1 %1479  ;;  %2398 = vxpose.xlu0.b32.cont [4/16] %v2397_v60, 128 }
 0x179   : > { %2078 = vst.msk [vmem:[%s2860_s21 + $0xc4] sm:$0xf] %vm966_vm1, %v1480_v41  ;;  %v1486_v44 = vpop.permute.xlu0 %1485 }
 0x17a   : > { %2081 = vst.msk [vmem:[%s2860_s21 + $0xd0] sm:$0xf] %vm966_vm1, %v1486_v44  ;;  %1223 = vrot.lane.b32.xlu1 %v3118_v5, %s2628_s22  ;;  %v3587_v5 = vpack.i.bf16 %v3190_v47, %v3181_v11 }
 0x17c   : > { %v1496_v46 = vpop.permute.xlu1 %1495  ;;  %2400 = vxpose.xlu0.b32.cont [5/16] %v3580_v48, 128 }
 0x17d   : > { %2086 = vst.msk [vmem:[%s2860_s21 + $0xe4] sm:$0xf] %vm966_vm1, %v1496_v46  ;;  %v1502_v51 = vpop.permute.xlu0 %1501 }
 0x17e   : > { %2089 = vst.msk [vmem:[%s2860_s21 + $0xf0] sm:$0xf] %vm966_vm1, %v1502_v51  ;;  %1597 = vrot.lane.b32.xlu1 %v3126_v33, %s2628_s22 }
 0x180   : > { %v1108_v54 = vpop.permute.xlu1 %1107  ;;  %2402 = vxpose.xlu0.b32.cont [6/16] %v3581_v55, 128 }
 0x181   : > { %1951 = vst.msk [vmem:[%s2860_s21 + $0x48] sm:$0xf] %vm966_vm1, %v1108_v54  ;;  %v1490_v56 = vpop.permute.xlu0 %1489 }
 0x182   : > { %2083 = vst.msk [vmem:[%s2860_s21 + $0xd8] sm:$0xf] %vm966_vm1, %v1490_v56  ;;  %1225 = vrot.lane.b32.xlu1 %v3141_v38, %s2628_s22 }
 0x184   : > { %v1124_v58 = vpop.permute.xlu1 %1123  ;;  %2404 = vxpose.xlu0.b32.cont [7/16] %v3582_v59, 128 }
 0x185   : > { %1959 = vst.msk [vmem:[%s2860_s21 + $0x68] sm:$0xf] %vm966_vm1, %v1124_v58  ;;  %v1506_v60 = vpop.permute.xlu0 %1505 }
 0x186   : > { %2091 = vst.msk [vmem:[%s2860_s21 + $0xf8] sm:$0xf] %vm966_vm1, %v1506_v60  ;;  %1227 = vrot.lane.b32.xlu1 %v3152_v13, %s2628_s22 }
 0x188   : > { %v1110_v62 = vpop.permute.xlu1 %1109  ;;  %2406 = vxpose.xlu0.b32.cont [8/16] %v3583_v63, 128 }
 0x189   : > { %1952 = vst.msk [vmem:[%s2860_s21 + $0x4c] sm:$0xf] %vm966_vm1, %v1110_v62  ;;  %v1210_v2 = vpop.permute.xlu0 %1209 }
 0x18a   : > { %1981 = vst.msk [vmem:[%s3002_s30 + $0x40] sm:$0xf] %vm966_vm1, %v1210_v2  ;;  %1601 = vrot.lane.b32.xlu1 %v3160_v1, %s2628_s22 }
 0x18c   : > { %v1126_v8 = vpop.permute.xlu1 %1125  ;;  %2408 = vxpose.xlu0.b32.cont [9/16] %v3584_v0, 128 }
 0x18d   : > { %1960 = vst.msk [vmem:[%s2860_s21 + $0x6c] sm:$0xf] %vm966_vm1, %v1126_v8  ;;  %v1584_v10 = vpop.permute.xlu0 %1583 }
 0x18e   : > { %2109 = vst.msk [vmem:[%s3002_s30 + $0xc0] sm:$0xf] %vm966_vm1, %v1584_v10  ;;  %1229 = vrot.lane.b32.xlu1 %v3175_v9, %s2628_s22 }
 0x190   : > { %v1484_v12 = vpop.permute.xlu1 %1483  ;;  %2410 = vxpose.xlu0.b32.cont [10/16] %v3585_v17, 128 }
 0x191   : > { %2080 = vst.msk [vmem:[%s2860_s21 + $0xcc] sm:$0xf] %vm966_vm1, %v1484_v12  ;;  %v1588_v18 = vpop.permute.xlu0 %1587 }
 0x192   : > { %2111 = vst.msk [vmem:[%s3002_s30 + $0xc8] sm:$0xf] %vm966_vm1, %v1588_v18  ;;  %1231 = vrot.lane.b32.xlu1 %v3186_v16, %s2628_s22 }
 0x194   : > { %v1500_v22 = vpop.permute.xlu1 %1499  ;;  %2412 = vxpose.xlu0.b32.cont [11/16] %v3586_v25, 128 }
 0x195   : > { %2088 = vst.msk [vmem:[%s2860_s21 + $0xec] sm:$0xf] %vm966_vm1, %v1500_v22 }
 0x196   : > { %1605 = vrot.lane.b32.xlu1 %v3194_v50, %s2628_s22 }
 0x198   : > { %v1112_v26 = vpop.permute.xlu1 %1111  ;;  %2414 = vxpose.xlu0.b32.cont [12/16] %v3587_v5, 128 }
 0x199   : > { %1953 = vst.msk [vmem:[%s2860_s21 + $0x50] sm:$0xf] %vm966_vm1, %v1112_v26  ;;  %v1592_v30 = vpop.permute.xlu0 %1591 }
 0x19a   : > { %2113 = vst.msk [vmem:[%s3002_s30 + $0xd0] sm:$0xf] %vm966_vm1, %v1592_v30  ;;  %1235 = vrot.lane.b32.xlu1 %v3217_v21, %s2628_s22 }
 0x19c   : > { %v1128_v33 = vpop.permute.xlu1 %1127  ;;  %2416 = vxpose.xlu0.b32.cont [13/16] %v3588_v36, 128 }
 0x19d   : > { %1961 = vst.msk [vmem:[%s2860_s21 + $0x70] sm:$0xf] %vm966_vm1, %v1128_v33 }
 0x19e   : > { %1609 = vrot.lane.b32.xlu1 %v3226_v24, %s2628_s22 }
 0x1a0   : > { %v1114_v38 = vpop.permute.xlu1 %1113  ;;  %2418 = vxpose.xlu0.b32.cont [14/16] %v3589_v43, 128 }
 0x1a1   : > { %1954 = vst.msk [vmem:[%s2860_s21 + $0x54] sm:$0xf] %vm966_vm1, %v1114_v38  ;;  %v1596_v53 = vpop.permute.xlu0 %1595 }
 0x1a2   : > { %2115 = vst.msk [vmem:[%s3002_s30 + $0xd8] sm:$0xf] %vm966_vm1, %v1596_v53  ;;  %1239 = vrot.lane.b32.xlu1 %v3251_v29, %s2628_s22 }
 0x1a4   : > { %v1130_v13 = vpop.permute.xlu1 %1129  ;;  %2420 = vxpose.xlu0.b32.cont [15/16] %v3590_v61, 128 }
 0x1a5   : > { %1962 = vst.msk [vmem:[%s2860_s21 + $0x74] sm:$0xf] %vm966_vm1, %v1130_v13 }
 0x1a6   : > { %1613 = vrot.lane.b32.xlu1 %v3261_v19, %s2628_s22 }
 0x1a8   : > { %v1488_v52 = vpop.permute.xlu1 %1487  ;;  %2422 = vxpose.xlu0.b32.end [16/16] %v2421_v14, 128 }
 0x1a9   : > { %2082 = vst.msk [vmem:[%s2860_s21 + $0xd4] sm:$0xf] %vm966_vm1, %v1488_v52  ;;  %v1600_v1 = vpop.permute.xlu0 %1599 }
 0x1aa   : > { %2117 = vst.msk [vmem:[%s3002_s30 + $0xe0] sm:$0xf] %vm966_vm1, %v1600_v1 }
 0x1ac   : > { %v1504_v4 = vpop.permute.xlu1 %1503 }
 0x1ad   : > { %2090 = vst.msk [vmem:[%s2860_s21 + $0xf4] sm:$0xf] %vm966_vm1, %v1504_v4 }
 0x1b0   : > { %v1116_v6 = vpop.permute.xlu1 %1115 }
 0x1b1   : > { %1955 = vst.msk [vmem:[%s2860_s21 + $0x58] sm:$0xf] %vm966_vm1, %v1116_v6  ;;  %v1604_v9 = vpop.permute.xlu0 %1603 }
 0x1b2   : > { %2119 = vst.msk [vmem:[%s3002_s30 + $0xe8] sm:$0xf] %vm966_vm1, %v1604_v9 }
 0x1b4   : > { %v1132_v7 = vpop.permute.xlu1 %1131 }
 0x1b5   : > { %1963 = vst.msk [vmem:[%s2860_s21 + $0x78] sm:$0xf] %vm966_vm1, %v1132_v7 }
 0x1b8   : > { %v1118_v14 = vpop.permute.xlu1 %1117  ;;  %v1234_v20 = vpop.permute.xlu0 %1233 }
 0x1b9   : > { %1956 = vst.msk [vmem:[%s2860_s21 + $0x5c] sm:$0xf] %vm966_vm1, %v1118_v14  ;;  %1993 = vst.msk [vmem:[%s3002_s30 + $0x70] sm:$0xf] %vm966_vm1, %v1234_v20 }
 0x1bc   : > { %v1134_v28 = vpop.permute.xlu1 %1133  ;;  %v1608_v11 = vpop.permute.xlu0 %1607 }
 0x1bd   : > { %1964 = vst.msk [vmem:[%s2860_s21 + $0x7c] sm:$0xf] %vm966_vm1, %v1134_v28  ;;  %2121 = vst.msk [vmem:[%s3002_s30 + $0xf0] sm:$0xf] %vm966_vm1, %v1608_v11 }
 0x1c0   : > { %v1492_v16 = vpop.permute.xlu1 %1491  ;;  %v1238_v47 = vpop.permute.xlu0 %1237 }
 0x1c1   : > { %2084 = vst.msk [vmem:[%s2860_s21 + $0xdc] sm:$0xf] %vm966_vm1, %v1492_v16  ;;  %1995 = vst.msk [vmem:[%s3002_s30 + $0x78] sm:$0xf] %vm966_vm1, %v1238_v47 }
 0x1c4   : > { %v1508_v50 = vpop.permute.xlu1 %1507 }
 0x1c5   : > { %2092 = vst.msk [vmem:[%s2860_s21 + $0xfc] sm:$0xf] %vm966_vm1, %v1508_v50  ;;  %s2553_s21 = scalar_lea.vmem %s2552_s14, 4096 }
 0x1c6   : > { %p2555_p2 = scmp.lt.s32.totalorder %s2553_s21, %s2547_s24 }
 0x1c8   : > { %v1212_v15 = vpop.permute.xlu1 %1211  ;;  %p2556_p3 = por %p2555_p2, %p2554_p1 }
 0x1c9   : > { %1982 = vst.msk [vmem:[%s3002_s30 + $0x44] sm:$0xf] %vm966_vm1, %v1212_v15 }
 0x1ca   : > { %p2557_p5 = pnand %p2556_p3, %p2550_p0 }
 0x1cc   : > { %v1586_v23 = vpop.permute.xlu1 %1585 }
 0x1cd   : > { %2110 = vst.msk [vmem:[%s3002_s30 + $0xc4] sm:$0xf] %vm966_vm1, %v1586_v23 }
 0x1d0   : > { %v1214_v21 = vpop.permute.xlu1 %1213 }
 0x1d1   : > { %1983 = vst.msk [vmem:[%s3002_s30 + $0x48] sm:$0xf] %vm966_vm1, %v1214_v21  ;;  %1611 = vrot.lane.b32.xlu0 %v3243_v35, %s2628_s22 }
 0x1d4   : > { %v1216_v24 = vpop.permute.xlu1 %1215 }
 0x1d5   : > { %1984 = vst.msk [vmem:[%s3002_s30 + $0x4c] sm:$0xf] %vm966_vm1, %v1216_v24 }
 0x1d8   : > { %v1590_v57 = vpop.permute.xlu1 %1589 }
 0x1d9   : > { %2112 = vst.msk [vmem:[%s3002_s30 + $0xcc] sm:$0xf] %vm966_vm1, %v1590_v57 }
 0x1dc   : > { %v1218_v3 = vpop.permute.xlu1 %1217 }
 0x1dd   : > { %1985 = vst.msk [vmem:[%s3002_s30 + $0x50] sm:$0xf] %vm966_vm1, %v1218_v3 }
 0x1e0   : > { %v1220_v29 = vpop.permute.xlu1 %1219 }
 0x1e1   : > { %1986 = vst.msk [vmem:[%s3002_s30 + $0x54] sm:$0xf] %vm966_vm1, %v1220_v29 }
 0x1e4   : > { %v1594_v39 = vpop.permute.xlu1 %1593 }
 0x1e5   : > { %2114 = vst.msk [vmem:[%s3002_s30 + $0xd4] sm:$0xf] %vm966_vm1, %v1594_v39 }
 0x1e8   : > { %v1222_v27 = vpop.permute.xlu1 %1221 }
 0x1e9   : > { %1987 = vst.msk [vmem:[%s3002_s30 + $0x58] sm:$0xf] %vm966_vm1, %v1222_v27 }
 0x1ec   : > { %v1224_v35 = vpop.permute.xlu1 %1223  ;;  %v2423_v19 = vpop.trf.xlu0 }
 0x1ed   : > { %1988 = vst.msk [vmem:[%s3002_s30 + $0x5c] sm:$0xf] %vm966_vm1, %v1224_v35  ;;  %v2427_v31 = vunpack.i.h.bf16 %v2423_v19  ;;  %v2424_v32 = vunpack.i.l.bf16 %v2423_v19 }
 0x1f0   : > { %v1598_v42 = vpop.permute.xlu1 %1597  ;;  %v2428_v45 = vpop.trf.xlu0 }
 0x1f1   : > { %2116 = vst.msk [vmem:[%s3002_s30 + $0xdc] sm:$0xf] %vm966_vm1, %v1598_v42  ;;  %v2432_v49 = vunpack.i.h.bf16 %v2428_v45  ;;  %v2429_v34 = vunpack.i.l.bf16 %v2428_v45 }
 0x1f3   : > { %v2233_v37 = vpack.c.bf16 %v2429_v34, %v2424_v32  ;;  %v2273_v40 = vpack.c.bf16 %v2432_v49, %v2427_v31 }
 0x1f4   : > { %v1226_v41 = vpop.permute.xlu1 %1225  ;;  %v2433_v44 = vpop.trf.xlu0 }
 0x1f5   : > { %1989 = vst.msk [vmem:[%s3002_s30 + $0x60] sm:$0xf] %vm966_vm1, %v1226_v41  ;;  %2234 = vst [vmem:[%s3476_s6] sm:$0xff] %v2233_v37   ;;  %v2437_v46 = vunpack.i.h.bf16 %v2433_v44  ;;  %v2434_v48 = vunpack.i.l.bf16 %v2433_v44 }
 0x1f6   : > { %2317 = vst [vmem:[%s3476_s6 + $0x40] sm:$0xff] %v2273_v40  }
 0x1f8   : > { %v1228_v51 = vpop.permute.xlu1 %1227  ;;  %v2438_v54 = vpop.trf.xlu0 }
 0x1f9   : > { %1990 = vst.msk [vmem:[%s3002_s30 + $0x64] sm:$0xf] %vm966_vm1, %v1228_v51  ;;  %v2442_v55 = vunpack.i.h.bf16 %v2438_v54  ;;  %v2439_v56 = vunpack.i.l.bf16 %v2438_v54 }
 0x1fb   : > { %v2238_v58 = vpack.c.bf16 %v2439_v56, %v2434_v48  ;;  %v2278_v59 = vpack.c.bf16 %v2442_v55, %v2437_v46 }
 0x1fc   : > { %v1602_v60 = vpop.permute.xlu1 %1601  ;;  %v2443_v62 = vpop.trf.xlu0 }
 0x1fd   : > { %2118 = vst.msk [vmem:[%s3002_s30 + $0xe4] sm:$0xf] %vm966_vm1, %v1602_v60  ;;  %2310 = vst [vmem:[%s3476_s6 + $0x8] sm:$0xff] %v2238_v58   ;;  %v2447_v63 = vunpack.i.h.bf16 %v2443_v62  ;;  %v2444_v2 = vunpack.i.l.bf16 %v2443_v62 }
 0x1fe   : > { %2318 = vst [vmem:[%s3476_s6 + $0x48] sm:$0xff] %v2278_v59  }
 0x200   : > { %v1230_v8 = vpop.permute.xlu1 %1229  ;;  %v2448_v0 = vpop.trf.xlu0 }
 0x201   : > { %1991 = vst.msk [vmem:[%s3002_s30 + $0x68] sm:$0xf] %vm966_vm1, %v1230_v8  ;;  %v2452_v10 = vunpack.i.h.bf16 %v2448_v0  ;;  %v2449_v12 = vunpack.i.l.bf16 %v2448_v0 }
 0x203   : > { %v2243_v17 = vpack.c.bf16 %v2449_v12, %v2444_v2  ;;  %v2283_v18 = vpack.c.bf16 %v2452_v10, %v2447_v63 }
 0x204   : > { %v1232_v22 = vpop.permute.xlu1 %1231  ;;  %v2453_v25 = vpop.trf.xlu0 }
 0x205   : > { %1992 = vst.msk [vmem:[%s3002_s30 + $0x6c] sm:$0xf] %vm966_vm1, %v1232_v22  ;;  %2311 = vst [vmem:[%s3476_s6 + $0x10] sm:$0xff] %v2243_v17   ;;  %v2457_v26 = vunpack.i.h.bf16 %v2453_v25  ;;  %v2454_v5 = vunpack.i.l.bf16 %v2453_v25 }
 0x206   : > { %2319 = vst [vmem:[%s3476_s6 + $0x50] sm:$0xff] %v2283_v18  }
 0x208   : > { %v1606_v30 = vpop.permute.xlu1 %1605  ;;  %v2458_v33 = vpop.trf.xlu0 }
 0x209   : > { %2120 = vst.msk [vmem:[%s3002_s30 + $0xec] sm:$0xf] %vm966_vm1, %v1606_v30  ;;  %v2462_v36 = vunpack.i.h.bf16 %v2458_v33  ;;  %v2459_v38 = vunpack.i.l.bf16 %v2458_v33 }
 0x20b   : > { %v2248_v43 = vpack.c.bf16 %v2459_v38, %v2454_v5  ;;  %v2288_v53 = vpack.c.bf16 %v2462_v36, %v2457_v26 }
 0x20c   : > { %v1236_v13 = vpop.permute.xlu1 %1235  ;;  %v2463_v61 = vpop.trf.xlu0 }
 0x20d   : > { %1994 = vst.msk [vmem:[%s3002_s30 + $0x74] sm:$0xf] %vm966_vm1, %v1236_v13  ;;  %2312 = vst [vmem:[%s3476_s6 + $0x18] sm:$0xff] %v2248_v43   ;;  %v2467_v52 = vunpack.i.h.bf16 %v2463_v61  ;;  %v2464_v1 = vunpack.i.l.bf16 %v2463_v61 }
 0x20e   : > { %2320 = vst [vmem:[%s3476_s6 + $0x58] sm:$0xff] %v2288_v53  }
 0x210   : > { %v1610_v4 = vpop.permute.xlu1 %1609  ;;  %v2468_v6 = vpop.trf.xlu0 }
 0x211   : > { %2122 = vst.msk [vmem:[%s3002_s30 + $0xf4] sm:$0xf] %vm966_vm1, %v1610_v4  ;;  %v2472_v9 = vunpack.i.h.bf16 %v2468_v6  ;;  %v2469_v7 = vunpack.i.l.bf16 %v2468_v6 }
 0x213   : > { %v2253_v14 = vpack.c.bf16 %v2469_v7, %v2464_v1  ;;  %v2293_v20 = vpack.c.bf16 %v2472_v9, %v2467_v52 }
 0x214   : > { %v1240_v28 = vpop.permute.xlu1 %1239  ;;  %v2473_v11 = vpop.trf.xlu0 }
 0x215   : > { %1996 = vst.msk [vmem:[%s3002_s30 + $0x7c] sm:$0xf] %vm966_vm1, %v1240_v28  ;;  %2313 = vst [vmem:[%s3476_s6 + $0x20] sm:$0xff] %v2253_v14   ;;  %v2477_v16 = vunpack.i.h.bf16 %v2473_v11  ;;  %v2474_v47 = vunpack.i.l.bf16 %v2473_v11 }
 0x216   : > { %2321 = vst [vmem:[%s3476_s6 + $0x60] sm:$0xff] %v2293_v20  }
 0x218   : > { %v1614_v50 = vpop.permute.xlu1 %1613  ;;  %v2478_v15 = vpop.trf.xlu0 }
 0x219   : > { %2124 = vst.msk [vmem:[%s3002_s30 + $0xfc] sm:$0xf] %vm966_vm1, %v1614_v50  ;;  %v2482_v23 = vunpack.i.h.bf16 %v2478_v15  ;;  %v2479_v21 = vunpack.i.l.bf16 %v2478_v15 }
 0x21b   : > { %v2258_v24 = vpack.c.bf16 %v2479_v21, %v2474_v47  ;;  %v2298_v57 = vpack.c.bf16 %v2482_v23, %v2477_v16 }
 0x21c   : > { %v2483_v3 = vpop.trf.xlu0 }
 0x21d   : > { %2314 = vst [vmem:[%s3476_s6 + $0x28] sm:$0xff] %v2258_v24   ;;  %2322 = vst [vmem:[%s3476_s6 + $0x68] sm:$0xff] %v2298_v57   ;;  %v2487_v29 = vunpack.i.h.bf16 %v2483_v3  ;;  %v2484_v39 = vunpack.i.l.bf16 %v2483_v3 }
 0x220   : > { %v2488_v27 = vpop.trf.xlu0 }
 0x221   : > { %v2492_v35 = vunpack.i.h.bf16 %v2488_v27  ;;  %v2489_v19 = vunpack.i.l.bf16 %v2488_v27 }
 0x223   : > { %v2263_v31 = vpack.c.bf16 %v2489_v19, %v2484_v39  ;;  %v2303_v32 = vpack.c.bf16 %v2492_v35, %v2487_v29 }
 0x224   : > { %v2493_v42 = vpop.trf.xlu0 }
 0x225   : > { %2315 = vst [vmem:[%s3476_s6 + $0x30] sm:$0xff] %v2263_v31   ;;  %2323 = vst [vmem:[%s3476_s6 + $0x70] sm:$0xff] %v2303_v32   ;;  %v2497_v45 = vunpack.i.h.bf16 %v2493_v42  ;;  %v2494_v49 = vunpack.i.l.bf16 %v2493_v42 }
 0x228   : > { %v2498_v34 = vpop.trf.xlu0 }
 0x229   : > { %v2502_v37 = vunpack.i.h.bf16 %v2498_v34  ;;  %v2499_v40 = vunpack.i.l.bf16 %v2498_v34 }
 0x22b   : > { %v2268_v41 = vpack.c.bf16 %v2499_v40, %v2494_v49  ;;  %v2308_v44 = vpack.c.bf16 %v2502_v37, %v2497_v45 }
 0x22d   : > { %2316 = vst [vmem:[%s3476_s6 + $0x38] sm:$0xff] %v2268_v41   ;;  %2324 = vst [vmem:[%s3476_s6 + $0x78] sm:$0xff] %v2308_v44  }
 0x22e   : > { %2560 = shalt.err (!%p2557_p5)
}
 0x22f   : > { %s2561_s26 = scalar_lea.hbm %s3515_s12, 2048  ;;  %s2565_s5 = scalar_lea.hbm %s3576_s3, 4096 }
 0x230   : > { %p2562_p6 = scmp.ne.s32.totalorder %s3515_s12, %s2561_s26  ;;  %p2566_p10 = scmp.lt.u32.totalorder %s3515_s12, %s3576_s3 }
 0x231   : > { %p2567_p11 = scmp.lt.u32.totalorder %s2565_s5, %s2561_s26  ;;  %p2569_p13 = scmp.lt.u32.totalorder %s2561_s26, %s3515_s12 }
 0x232   : > { %p2563_p7 = pnand %p2562_p6, %p2696_p4 }
 0x233   : > { %p2568_p12 = por %p2567_p11, %p2566_p10 }
 0x234   : > { %p2564_p9 = pneg %p2563_p7 }
 0x235   : > { %p2570_p0 = por %p2569_p13, %p2568_p12 }
 0x237   : > { %p2571_p1 = pnand %p2570_p0, %p2564_p9 }
 0x239   : > { %2574 = shalt.err (!%p2571_p1)
}
 0x23a   : > { %s2630_s10 = smov 4  }
 0x23b   : > { %2333 = dma.vmem_to_hbm [thread:$0]  (%p2696_p4), %s3517_s8, 2048, %s3515_s12, %s3523_s18, %s2628_s22, %s2628_s22, %s2630_s10  }
 0x243   : > { %v1612_v46 = vpop.permute.xlu0 %1611 }
 0x244   : > { %2123 = vst.msk [vmem:[%s3002_s30 + $0xf8] sm:$0xf] %vm966_vm1, %v1612_v46 }
 0x245 PF: > { %p2339_p2 = scmp.ge.s32.totalorder %s2625_s20, 2  ;;  %s1716_s11 = sand.u32 1, %s2605_s15  }
 0x246   : > { %s1717_s24 = scalar_lea.sflag [#allocation3], %s1716_s11 }
 0x247   : > { %p2336_p3 = pnand %p2339_p2, %p2703_p8 }
 0x249   : > { %2600 = dma.done.wait (!%p2336_p3), %s1717_s24, 2048  }
 0x24a   : > { %2602 = vsyncadd (!%p2336_p3), %s1717_s24, 4294965248  ;;  %s18_s20 = sadd.s32 1, %s2625_s20   ;;  %s3591_s15 = smov %s2609_s16 }
 0x24b   : > { %p15_p5 = scmp.ge.s32.totalorder %s18_s20, 4   ;;  %s3592_s16 = smov %s2613_s17 }
 0x24c   : > { %s3593_s17 = smov %s2709_s28  ;;  %s3594_s18 = smov %s2621_s19 }
 0x24d   : > { %s3595_s19 = smov %s3597_s23  ;;  %17 = sbr.rel (!%p15_p5) target bundleno = 4 (0x4), region = 96 }
 0x254   :  { %1734 = vsyncpa [#allocation3], 1 }
 0x255   :  { %1736 = vsyncpa [#allocation3 + $0x1], 1 }

</bundles_post_ra>
